<compile_context>
chip_gen: v6e
topology: v6e:2x2x1
jax: 0.10.0
libtpu: 0.0.40
codegen_flags: <defaults>
</compile_context>

<pallas_src>
import functools
import math

import jax
import jax.numpy as jnp
from jax.experimental import pallas as pl
from jax.experimental.pallas import tpu as pltpu


# ----------------------------- Pallas kernel -----------------------------

def _vq_decoder_kernel(x_ref, w_ref, b_ref, o_ref, *, seq_len, n_resblk, n_up, group):
    """Fused VQDecoderV7 forward on one row tile (whole sequences per tile).

    x_ref: [Mt, C]     Mt = (seqs_per_tile * T) rows, C = 128-padded channels, f32
    w_ref: [L, C, C]   per-layer folded taps [3*Cin rows -> Cout cols], bf16
    b_ref: [L, 1, C]   per-layer bias, zero padded, f32
    o_ref: [Mt, C]     f32
    """
    Mt, C = x_ref.shape
    # timestep of each row (rows are laid out as b*T + t, tiles start on sequence
    # boundaries); stops the k=3 taps from leaking across sequence boundaries.
    t = jax.lax.broadcasted_iota(jnp.int32, (Mt, C), 0) % seq_len
    not_first = t != 0
    not_last = t != seq_len - 1

    def conv(h, layer):
        # PyTorch Conv1d(k=3, stride=1, padding=1):
        #   y[t] = W0 @ x[t-1] + W1 @ x[t] + W2 @ x[t+1] + b   (zero padded ends)
        # Folded into ONE matmul: lhs lanes [0:G) = x[t-1], [G:2G) = x[t], [2G:3G) = x[t+1].
        prev = jnp.where(not_first, pltpu.roll(h, 1, axis=0), 0.0)        # x[t-1]
        nxt = jnp.where(not_last, pltpu.roll(h, Mt - 1, axis=0), 0.0)     # x[t+1]
        # h / prev / nxt are zero beyond their true channel count (< group), so the
        # lane rolls place each tap in its own disjoint lane group.
        lhs = prev + pltpu.roll(h, group, axis=1) + pltpu.roll(nxt, 2 * group, axis=1)
        y = jnp.dot(lhs.astype(jnp.bfloat16), w_ref[layer],
                    preferred_element_type=jnp.float32)
        return y + b_ref[layer]

    def lrelu(v):
        return jnp.where(v > 0, v, 0.2 * v)

    h = x_ref[...].astype(jnp.float32)
    layer = 0
    for _ in range(n_resblk):            # ResBlock: conv -> LeakyReLU -> conv, + skip
        res = h
        h = lrelu(conv(h, layer)); layer += 1
        h = conv(h, layer) + res; layer += 1
    for _ in range(n_up):                # "up" convs (module has no actual Upsample)
        h = lrelu(conv(h, layer)); layer += 1
    h = conv(h, layer)                   # final conv, no activation
    o_ref[...] = h.astype(o_ref.dtype)


# ----------------------------- wrappers -----------------------------

def _round_up(n, m):
    return (n + m - 1) // m * m


def pack_conv_params(conv_params, cpad, group):
    """conv_params: list of (w [Cout, Cin, 3] in PyTorch layout, b [Cout]).

    Folds the 3 taps of each conv into one [cpad, cpad] matrix: tap k occupies
    rows [k*group, k*group+Cin), columns [0, Cout).  Weights stored bf16.
    """
    L = len(conv_params)
    w_stack = jnp.zeros((L, cpad, cpad), jnp.float32)
    b_stack = jnp.zeros((L, 1, cpad), jnp.float32)
    for l, (w, b) in enumerate(conv_params):
        cout, cin, _ = w.shape
        for k in range(3):
            w_stack = w_stack.at[l, k * group:k * group + cin, :cout].set(w[:, :, k].T)
        b_stack = b_stack.at[l, 0, :cout].set(b)
    return w_stack.astype(jnp.bfloat16), b_stack


def vq_decoder_v7_forward(x, conv_params, *, n_resblk=2, n_up=2, cpad=128,
                          target_tile_rows=1024):
    """x: [B, T, vae_length] -> [B, T, vae_test_dim + 4]."""
    B, T, cin = x.shape
    L = len(conv_params)
    assert L == 2 * n_resblk + n_up + 1
    out_dim = conv_params[-1][1].shape[0]

    # Lane-group stride for the 3-tap fold.
    group = max(max(w.shape[0], w.shape[1]) for w, _ in conv_params)
    group = max(group, cin)
    assert 3 * group <= cpad, "channel count too large to fold 3 taps into one 128-lane tile"

    w_stack, b_stack = pack_conv_params(conv_params, cpad, group)

    # Row tiling on sequence boundaries (tile rows = seqs_per_tile * T, multiple of 8).
    seq_mult = 8 // math.gcd(T, 8)                       # seqs/tile must be a multiple
    s_tile = max(seq_mult, (target_tile_rows // T) // seq_mult * seq_mult)
    s_tile = min(s_tile, _round_up(B, seq_mult))         # don't over-pad tiny batches
    B_pad = _round_up(B, s_tile)
    tile_rows = s_tile * T
    grid = (B_pad // s_tile,)

    M = B * T
    x2d = jnp.zeros((B_pad * T, cpad), jnp.float32).at[:M, :cin].set(
        x.reshape(M, cin).astype(jnp.float32))

    out2d = pl.pallas_call(
        functools.partial(_vq_decoder_kernel, seq_len=T, n_resblk=n_resblk,
                          n_up=n_up, group=group),
        out_shape=jax.ShapeDtypeStruct((B_pad * T, cpad), jnp.float32),
        grid=grid,
        in_specs=[
            pl.BlockSpec((tile_rows, cpad), lambda i: (i, 0)),
            pl.BlockSpec((L, cpad, cpad), lambda i: (0, 0, 0)),   # grid-invariant weights
            pl.BlockSpec((L, 1, cpad), lambda i: (0, 0, 0)),      # grid-invariant bias
        ],
        out_specs=pl.BlockSpec((tile_rows, cpad), lambda i: (i, 0)),
        compiler_params=pltpu.CompilerParams(
            dimension_semantics=("parallel",),           # independent tiles -> megacore / dual-TC
            vmem_limit_bytes=32 * 1024 * 1024),
    )(x2d, w_stack, b_stack)

    return out2d[:M, :out_dim].reshape(B, T, out_dim)


# ----------------------------- parameter init -----------------------------

def init_conv_params(key, vae_length, vae_test_dim, n_up, n_resblk=2):
    """Conv stack exactly as built by VQDecoderV7.__init__ (PyTorch weight layout)."""
    channels = [vae_length] * n_up + [vae_test_dim + 4]
    shapes = []                                   # (Cout, Cin) per conv
    # input_size == channels[0]  ->  no stem conv
    for _ in range(n_resblk):
        shapes += [(vae_length, vae_length), (vae_length, vae_length)]
    for i in range(n_up):
        shapes += [(channels[i + 1], channels[i])]
    shapes += [(channels[-1], channels[-1])]

    params = []
    keys = jax.random.split(key, 2 * len(shapes))
    for j, (cout, cin) in enumerate(shapes):
        bound = 1.0 / math.sqrt(cin * 3)
        w = jax.random.uniform(keys[2 * j], (cout, cin, 3), jnp.float32, -bound, bound)
        b = jax.random.uniform(keys[2 * j + 1], (cout,), jnp.float32, -bound, bound)
        params.append((w, b))
    return params


# ----------------------------- pure-JAX reference -----------------------------

def _conv1d_ref(x, w, b):
    """PyTorch-equivalent Conv1d(k=3, stride=1, padding=1) on [B, T, C] input."""
    y = jax.lax.conv_general_dilated(
        jnp.transpose(x, (0, 2, 1)), w,
        window_strides=(1,), padding=((1, 1),),
        dimension_numbers=("NCH", "OIH", "NCH"),
        precision=jax.lax.Precision.HIGHEST)
    return jnp.transpose(y, (0, 2, 1)) + b


def vq_decoder_v7_reference(x, conv_params, n_resblk=2, n_up=2):
    lrelu = lambda v: jnp.where(v > 0, v, 0.2 * v)
    h = x
    i = 0
    for _ in range(n_resblk):
        res = h
        h = _conv1d_ref(h, *conv_params[i]); i += 1
        h = lrelu(h)
        h = _conv1d_ref(h, *conv_params[i]); i += 1
        h = h + res
    for _ in range(n_up):
        h = _conv1d_ref(h, *conv_params[i]); i += 1
        h = lrelu(h)
    return _conv1d_ref(h, *conv_params[i])


# ----------------------------- main -----------------------------

if __name__ == "__main__":
    VAE_LENGTH = 32      # args.vae_length
    VAE_TEST_DIM = 16    # args.vae_test_dim  (output channels = 16 + 4 = 20)
    VAE_LAYER = 2        # args.vae_layer  (= n_up)
    B, T = 2, 16

    key = jax.random.PRNGKey(0)
    pkey, xkey = jax.random.split(key)
    params = init_conv_params(pkey, VAE_LENGTH, VAE_TEST_DIM, VAE_LAYER)
    x = jax.random.normal(xkey, (B, T, VAE_LENGTH), jnp.float32)

    ref = vq_decoder_v7_reference(x, params, n_resblk=2, n_up=VAE_LAYER)
    scale = max(1.0, float(jnp.max(jnp.abs(ref))))

    # Single-tile path (grid=(1,)).
    out = vq_decoder_v7_forward(x, params, n_resblk=2, n_up=VAE_LAYER)
    jax.block_until_ready(out)
    assert out.shape == (B, T, VAE_TEST_DIM + 4), out.shape
    err = float(jnp.max(jnp.abs(out - ref)))
    # bf16 MXU operands over a 7-layer chain -> allow 2e-2 relative error.
    assert err <= 2e-2 * scale, f"mismatch vs reference: max|err|={err}, scale={scale}"

    # Multi-tile path (one sequence per tile, grid=(2,)) exercises the row grid.
    out_tiled = vq_decoder_v7_forward(x, params, n_resblk=2, n_up=VAE_LAYER,
                                      target_tile_rows=T)
    jax.block_until_ready(out_tiled)
    err_tiled = float(jnp.max(jnp.abs(out_tiled - ref)))
    assert err_tiled <= 2e-2 * scale, \
        f"tiled mismatch vs reference: max|err|={err_tiled}, scale={scale}"

    print("KERNEL_OK")
</pallas_src>

<mosaic_0001>
module attributes {stable_mosaic.version = 11 : i64} {
  func.func @_vq_decoder_kernel(%arg0: i32, %arg1: memref<32x128xf32, #tpu.memory_space<vmem>>, %arg2: memref<7x128x128xbf16, #tpu.memory_space<vmem>>, %arg3: memref<7x1x128xf32, #tpu.memory_space<vmem>>, %arg4: memref<32x128xf32, #tpu.memory_space<vmem>>) attributes {dimension_semantics = [#tpu.dimension_semantics<parallel>], iteration_bounds = array<i64: 1>, scalar_prefetch = 0 : i64, scratch_operands = 0 : i64, tpu.core_type = #tpu.core_type<tc>, window_params = [{transform_indices = @transform_0, window_bounds = array<i64: 32, 128>}, {pipeline_mode = #tpu.pipeline_mode<synchronous>, transform_indices = @transform_1, window_bounds = array<i64: 7, 128, 128>}, {pipeline_mode = #tpu.pipeline_mode<synchronous>, transform_indices = @transform_2, window_bounds = array<i64: 7, 1, 128>}, {transform_indices = @transform_3, window_bounds = array<i64: 32, 128>}]} {
    %0 = tpu.iota {dimensions = array<i32: 0>} : vector<32x128xi32>
    %c16_i32 = arith.constant 16 : i32
    %c0_i32 = arith.constant 0 : i32
    %1 = arith.cmpi eq, %c16_i32, %c0_i32 : i32
    %c1_i32 = arith.constant 1 : i32
    %2 = arith.select %1, %c1_i32, %c16_i32 : i32
    %3 = vector.broadcast %2 : i32 to vector<32x128xi32>
    %4 = arith.remsi %0, %3 : vector<32x128xi32>
    %c0_i32_0 = arith.constant 0 : i32
    %5 = vector.broadcast %c0_i32_0 : i32 to vector<32x128xi32>
    %6 = arith.cmpi ne, %4, %5 : vector<32x128xi32>
    %c0_i32_1 = arith.constant 0 : i32
    %7 = vector.broadcast %c0_i32_1 : i32 to vector<32x128xi32>
    %8 = arith.cmpi slt, %4, %7 : vector<32x128xi32>
    %c0_i32_2 = arith.constant 0 : i32
    %9 = arith.cmpi slt, %2, %c0_i32_2 : i32
    %10 = vector.broadcast %9 : i1 to vector<32x128xi1>
    %11 = vector.broadcast %10 : vector<32x128xi1> to vector<32x128xi1>
    %12 = arith.xori %8, %11 : vector<32x128xi1>
    %13 = arith.andi %12, %6 : vector<32x128xi1>
    %14 = vector.broadcast %2 : i32 to vector<32x128xi32>
    %15 = arith.addi %4, %14 : vector<32x128xi32>
    %16 = arith.select %13, %15, %4 : vector<32x128xi1>, vector<32x128xi32>
    %c0_i32_3 = arith.constant 0 : i32
    %17 = vector.broadcast %c0_i32_3 : i32 to vector<32x128xi32>
    %18 = arith.cmpi ne, %16, %17 : vector<32x128xi32>
    %c15_i32 = arith.constant 15 : i32
    %19 = vector.broadcast %c15_i32 : i32 to vector<32x128xi32>
    %20 = arith.cmpi ne, %16, %19 : vector<32x128xi32>
    %c0 = arith.constant 0 : index
    %c0_4 = arith.constant 0 : index
    %21 = vector.load %arg1[%c0, %c0_4] : memref<32x128xf32, #tpu.memory_space<vmem>>, vector<32x128xf32>
    %c1_i32_5 = arith.constant 1 : i32
    %22 = tpu.dynamic_rotate %21 by %c1_i32_5 dim 0 : vector<32x128xf32>, i32 -> vector<32x128xf32>
    %cst = arith.constant 0.000000e+00 : f32
    %23 = vector.broadcast %cst : f32 to vector<32x128xf32>
    %24 = arith.select %18, %22, %23 : vector<32x128xi1>, vector<32x128xf32>
    %c31_i32 = arith.constant 31 : i32
    %25 = tpu.dynamic_rotate %21 by %c31_i32 dim 0 : vector<32x128xf32>, i32 -> vector<32x128xf32>
    %cst_6 = arith.constant 0.000000e+00 : f32
    %26 = vector.broadcast %cst_6 : f32 to vector<32x128xf32>
    %27 = arith.select %20, %25, %26 : vector<32x128xi1>, vector<32x128xf32>
    %c32_i32 = arith.constant 32 : i32
    %28 = tpu.dynamic_rotate %21 by %c32_i32 dim 1 : vector<32x128xf32>, i32 -> vector<32x128xf32>
    %29 = arith.addf %24, %28 : vector<32x128xf32>
    %c64_i32 = arith.constant 64 : i32
    %30 = tpu.dynamic_rotate %27 by %c64_i32 dim 1 : vector<32x128xf32>, i32 -> vector<32x128xf32>
    %31 = arith.addf %29, %30 : vector<32x128xf32>
    %32 = arith.truncf %31 : vector<32x128xf32> to vector<32x128xbf16>
    %c0_7 = arith.constant 0 : index
    %c0_8 = arith.constant 0 : index
    %c0_9 = arith.constant 0 : index
    %33 = vector.load %arg2[%c0_7, %c0_8, %c0_9] : memref<7x128x128xbf16, #tpu.memory_space<vmem>>, vector<1x128x128xbf16>
    %34 = vector.shape_cast %33 : vector<1x128x128xbf16> to vector<128x128xbf16>
    %cst_10 = arith.constant dense<0.000000e+00> : vector<32x128xf32>
    %35 = tpu.matmul %32, %34, %cst_10 {dimension_numbers = #tpu.dot_dimension_numbers<[1], [0], [0], [1], [0, 0, 1, 1], [], []>} : vector<32x128xbf16>, vector<128x128xbf16>, vector<32x128xf32> -> vector<32x128xf32>
    %c0_11 = arith.constant 0 : index
    %c0_12 = arith.constant 0 : index
    %c0_13 = arith.constant 0 : index
    %36 = vector.load %arg3[%c0_11, %c0_12, %c0_13] : memref<7x1x128xf32, #tpu.memory_space<vmem>>, vector<1x1x128xf32>
    %37 = vector.shape_cast %36 : vector<1x1x128xf32> to vector<1x128xf32>
    %38 = vector.broadcast %37 : vector<1x128xf32> to vector<32x128xf32>
    %39 = arith.addf %35, %38 : vector<32x128xf32>
    %cst_14 = arith.constant 0.000000e+00 : f32
    %40 = vector.broadcast %cst_14 : f32 to vector<32x128xf32>
    %41 = arith.cmpf ogt, %39, %40 : vector<32x128xf32>
    %cst_15 = arith.constant 2.000000e-01 : f32
    %42 = vector.broadcast %cst_15 : f32 to vector<32x128xf32>
    %43 = arith.mulf %42, %39 : vector<32x128xf32>
    %44 = arith.select %41, %39, %43 : vector<32x128xi1>, vector<32x128xf32>
    %c1_i32_16 = arith.constant 1 : i32
    %45 = tpu.dynamic_rotate %44 by %c1_i32_16 dim 0 : vector<32x128xf32>, i32 -> vector<32x128xf32>
    %cst_17 = arith.constant 0.000000e+00 : f32
    %46 = vector.broadcast %cst_17 : f32 to vector<32x128xf32>
    %47 = arith.select %18, %45, %46 : vector<32x128xi1>, vector<32x128xf32>
    %c31_i32_18 = arith.constant 31 : i32
    %48 = tpu.dynamic_rotate %44 by %c31_i32_18 dim 0 : vector<32x128xf32>, i32 -> vector<32x128xf32>
    %cst_19 = arith.constant 0.000000e+00 : f32
    %49 = vector.broadcast %cst_19 : f32 to vector<32x128xf32>
    %50 = arith.select %20, %48, %49 : vector<32x128xi1>, vector<32x128xf32>
    %c32_i32_20 = arith.constant 32 : i32
    %51 = tpu.dynamic_rotate %44 by %c32_i32_20 dim 1 : vector<32x128xf32>, i32 -> vector<32x128xf32>
    %52 = arith.addf %47, %51 : vector<32x128xf32>
    %c64_i32_21 = arith.constant 64 : i32
    %53 = tpu.dynamic_rotate %50 by %c64_i32_21 dim 1 : vector<32x128xf32>, i32 -> vector<32x128xf32>
    %54 = arith.addf %52, %53 : vector<32x128xf32>
    %55 = arith.truncf %54 : vector<32x128xf32> to vector<32x128xbf16>
    %c1 = arith.constant 1 : index
    %c0_22 = arith.constant 0 : index
    %c0_23 = arith.constant 0 : index
    %56 = vector.load %arg2[%c1, %c0_22, %c0_23] : memref<7x128x128xbf16, #tpu.memory_space<vmem>>, vector<1x128x128xbf16>
    %57 = vector.shape_cast %56 : vector<1x128x128xbf16> to vector<128x128xbf16>
    %cst_24 = arith.constant dense<0.000000e+00> : vector<32x128xf32>
    %58 = tpu.matmul %55, %57, %cst_24 {dimension_numbers = #tpu.dot_dimension_numbers<[1], [0], [0], [1], [0, 0, 1, 1], [], []>} : vector<32x128xbf16>, vector<128x128xbf16>, vector<32x128xf32> -> vector<32x128xf32>
    %c1_25 = arith.constant 1 : index
    %c0_26 = arith.constant 0 : index
    %c0_27 = arith.constant 0 : index
    %59 = vector.load %arg3[%c1_25, %c0_26, %c0_27] : memref<7x1x128xf32, #tpu.memory_space<vmem>>, vector<1x1x128xf32>
    %60 = vector.shape_cast %59 : vector<1x1x128xf32> to vector<1x128xf32>
    %61 = vector.broadcast %60 : vector<1x128xf32> to vector<32x128xf32>
    %62 = arith.addf %58, %61 : vector<32x128xf32>
    %63 = arith.addf %62, %21 : vector<32x128xf32>
    %c1_i32_28 = arith.constant 1 : i32
    %64 = tpu.dynamic_rotate %63 by %c1_i32_28 dim 0 : vector<32x128xf32>, i32 -> vector<32x128xf32>
    %cst_29 = arith.constant 0.000000e+00 : f32
    %65 = vector.broadcast %cst_29 : f32 to vector<32x128xf32>
    %66 = arith.select %18, %64, %65 : vector<32x128xi1>, vector<32x128xf32>
    %c31_i32_30 = arith.constant 31 : i32
    %67 = tpu.dynamic_rotate %63 by %c31_i32_30 dim 0 : vector<32x128xf32>, i32 -> vector<32x128xf32>
    %cst_31 = arith.constant 0.000000e+00 : f32
    %68 = vector.broadcast %cst_31 : f32 to vector<32x128xf32>
    %69 = arith.select %20, %67, %68 : vector<32x128xi1>, vector<32x128xf32>
    %c32_i32_32 = arith.constant 32 : i32
    %70 = tpu.dynamic_rotate %63 by %c32_i32_32 dim 1 : vector<32x128xf32>, i32 -> vector<32x128xf32>
    %71 = arith.addf %66, %70 : vector<32x128xf32>
    %c64_i32_33 = arith.constant 64 : i32
    %72 = tpu.dynamic_rotate %69 by %c64_i32_33 dim 1 : vector<32x128xf32>, i32 -> vector<32x128xf32>
    %73 = arith.addf %71, %72 : vector<32x128xf32>
    %74 = arith.truncf %73 : vector<32x128xf32> to vector<32x128xbf16>
    %c2 = arith.constant 2 : index
    %c0_34 = arith.constant 0 : index
    %c0_35 = arith.constant 0 : index
    %75 = vector.load %arg2[%c2, %c0_34, %c0_35] : memref<7x128x128xbf16, #tpu.memory_space<vmem>>, vector<1x128x128xbf16>
    %76 = vector.shape_cast %75 : vector<1x128x128xbf16> to vector<128x128xbf16>
    %cst_36 = arith.constant dense<0.000000e+00> : vector<32x128xf32>
    %77 = tpu.matmul %74, %76, %cst_36 {dimension_numbers = #tpu.dot_dimension_numbers<[1], [0], [0], [1], [0, 0, 1, 1], [], []>} : vector<32x128xbf16>, vector<128x128xbf16>, vector<32x128xf32> -> vector<32x128xf32>
    %c2_37 = arith.constant 2 : index
    %c0_38 = arith.constant 0 : index
    %c0_39 = arith.constant 0 : index
    %78 = vector.load %arg3[%c2_37, %c0_38, %c0_39] : memref<7x1x128xf32, #tpu.memory_space<vmem>>, vector<1x1x128xf32>
    %79 = vector.shape_cast %78 : vector<1x1x128xf32> to vector<1x128xf32>
    %80 = vector.broadcast %79 : vector<1x128xf32> to vector<32x128xf32>
    %81 = arith.addf %77, %80 : vector<32x128xf32>
    %cst_40 = arith.constant 0.000000e+00 : f32
    %82 = vector.broadcast %cst_40 : f32 to vector<32x128xf32>
    %83 = arith.cmpf ogt, %81, %82 : vector<32x128xf32>
    %cst_41 = arith.constant 2.000000e-01 : f32
    %84 = vector.broadcast %cst_41 : f32 to vector<32x128xf32>
    %85 = arith.mulf %84, %81 : vector<32x128xf32>
    %86 = arith.select %83, %81, %85 : vector<32x128xi1>, vector<32x128xf32>
    %c1_i32_42 = arith.constant 1 : i32
    %87 = tpu.dynamic_rotate %86 by %c1_i32_42 dim 0 : vector<32x128xf32>, i32 -> vector<32x128xf32>
    %cst_43 = arith.constant 0.000000e+00 : f32
    %88 = vector.broadcast %cst_43 : f32 to vector<32x128xf32>
    %89 = arith.select %18, %87, %88 : vector<32x128xi1>, vector<32x128xf32>
    %c31_i32_44 = arith.constant 31 : i32
    %90 = tpu.dynamic_rotate %86 by %c31_i32_44 dim 0 : vector<32x128xf32>, i32 -> vector<32x128xf32>
    %cst_45 = arith.constant 0.000000e+00 : f32
    %91 = vector.broadcast %cst_45 : f32 to vector<32x128xf32>
    %92 = arith.select %20, %90, %91 : vector<32x128xi1>, vector<32x128xf32>
    %c32_i32_46 = arith.constant 32 : i32
    %93 = tpu.dynamic_rotate %86 by %c32_i32_46 dim 1 : vector<32x128xf32>, i32 -> vector<32x128xf32>
    %94 = arith.addf %89, %93 : vector<32x128xf32>
    %c64_i32_47 = arith.constant 64 : i32
    %95 = tpu.dynamic_rotate %92 by %c64_i32_47 dim 1 : vector<32x128xf32>, i32 -> vector<32x128xf32>
    %96 = arith.addf %94, %95 : vector<32x128xf32>
    %97 = arith.truncf %96 : vector<32x128xf32> to vector<32x128xbf16>
    %c3 = arith.constant 3 : index
    %c0_48 = arith.constant 0 : index
    %c0_49 = arith.constant 0 : index
    %98 = vector.load %arg2[%c3, %c0_48, %c0_49] : memref<7x128x128xbf16, #tpu.memory_space<vmem>>, vector<1x128x128xbf16>
    %99 = vector.shape_cast %98 : vector<1x128x128xbf16> to vector<128x128xbf16>
    %cst_50 = arith.constant dense<0.000000e+00> : vector<32x128xf32>
    %100 = tpu.matmul %97, %99, %cst_50 {dimension_numbers = #tpu.dot_dimension_numbers<[1], [0], [0], [1], [0, 0, 1, 1], [], []>} : vector<32x128xbf16>, vector<128x128xbf16>, vector<32x128xf32> -> vector<32x128xf32>
    %c3_51 = arith.constant 3 : index
    %c0_52 = arith.constant 0 : index
    %c0_53 = arith.constant 0 : index
    %101 = vector.load %arg3[%c3_51, %c0_52, %c0_53] : memref<7x1x128xf32, #tpu.memory_space<vmem>>, vector<1x1x128xf32>
    %102 = vector.shape_cast %101 : vector<1x1x128xf32> to vector<1x128xf32>
    %103 = vector.broadcast %102 : vector<1x128xf32> to vector<32x128xf32>
    %104 = arith.addf %100, %103 : vector<32x128xf32>
    %105 = arith.addf %104, %63 : vector<32x128xf32>
    %c1_i32_54 = arith.constant 1 : i32
    %106 = tpu.dynamic_rotate %105 by %c1_i32_54 dim 0 : vector<32x128xf32>, i32 -> vector<32x128xf32>
    %cst_55 = arith.constant 0.000000e+00 : f32
    %107 = vector.broadcast %cst_55 : f32 to vector<32x128xf32>
    %108 = arith.select %18, %106, %107 : vector<32x128xi1>, vector<32x128xf32>
    %c31_i32_56 = arith.constant 31 : i32
    %109 = tpu.dynamic_rotate %105 by %c31_i32_56 dim 0 : vector<32x128xf32>, i32 -> vector<32x128xf32>
    %cst_57 = arith.constant 0.000000e+00 : f32
    %110 = vector.broadcast %cst_57 : f32 to vector<32x128xf32>
    %111 = arith.select %20, %109, %110 : vector<32x128xi1>, vector<32x128xf32>
    %c32_i32_58 = arith.constant 32 : i32
    %112 = tpu.dynamic_rotate %105 by %c32_i32_58 dim 1 : vector<32x128xf32>, i32 -> vector<32x128xf32>
    %113 = arith.addf %108, %112 : vector<32x128xf32>
    %c64_i32_59 = arith.constant 64 : i32
    %114 = tpu.dynamic_rotate %111 by %c64_i32_59 dim 1 : vector<32x128xf32>, i32 -> vector<32x128xf32>
    %115 = arith.addf %113, %114 : vector<32x128xf32>
    %116 = arith.truncf %115 : vector<32x128xf32> to vector<32x128xbf16>
    %c4 = arith.constant 4 : index
    %c0_60 = arith.constant 0 : index
    %c0_61 = arith.constant 0 : index
    %117 = vector.load %arg2[%c4, %c0_60, %c0_61] : memref<7x128x128xbf16, #tpu.memory_space<vmem>>, vector<1x128x128xbf16>
    %118 = vector.shape_cast %117 : vector<1x128x128xbf16> to vector<128x128xbf16>
    %cst_62 = arith.constant dense<0.000000e+00> : vector<32x128xf32>
    %119 = tpu.matmul %116, %118, %cst_62 {dimension_numbers = #tpu.dot_dimension_numbers<[1], [0], [0], [1], [0, 0, 1, 1], [], []>} : vector<32x128xbf16>, vector<128x128xbf16>, vector<32x128xf32> -> vector<32x128xf32>
    %c4_63 = arith.constant 4 : index
    %c0_64 = arith.constant 0 : index
    %c0_65 = arith.constant 0 : index
    %120 = vector.load %arg3[%c4_63, %c0_64, %c0_65] : memref<7x1x128xf32, #tpu.memory_space<vmem>>, vector<1x1x128xf32>
    %121 = vector.shape_cast %120 : vector<1x1x128xf32> to vector<1x128xf32>
    %122 = vector.broadcast %121 : vector<1x128xf32> to vector<32x128xf32>
    %123 = arith.addf %119, %122 : vector<32x128xf32>
    %cst_66 = arith.constant 0.000000e+00 : f32
    %124 = vector.broadcast %cst_66 : f32 to vector<32x128xf32>
    %125 = arith.cmpf ogt, %123, %124 : vector<32x128xf32>
    %cst_67 = arith.constant 2.000000e-01 : f32
    %126 = vector.broadcast %cst_67 : f32 to vector<32x128xf32>
    %127 = arith.mulf %126, %123 : vector<32x128xf32>
    %128 = arith.select %125, %123, %127 : vector<32x128xi1>, vector<32x128xf32>
    %c1_i32_68 = arith.constant 1 : i32
    %129 = tpu.dynamic_rotate %128 by %c1_i32_68 dim 0 : vector<32x128xf32>, i32 -> vector<32x128xf32>
    %cst_69 = arith.constant 0.000000e+00 : f32
    %130 = vector.broadcast %cst_69 : f32 to vector<32x128xf32>
    %131 = arith.select %18, %129, %130 : vector<32x128xi1>, vector<32x128xf32>
    %c31_i32_70 = arith.constant 31 : i32
    %132 = tpu.dynamic_rotate %128 by %c31_i32_70 dim 0 : vector<32x128xf32>, i32 -> vector<32x128xf32>
    %cst_71 = arith.constant 0.000000e+00 : f32
    %133 = vector.broadcast %cst_71 : f32 to vector<32x128xf32>
    %134 = arith.select %20, %132, %133 : vector<32x128xi1>, vector<32x128xf32>
    %c32_i32_72 = arith.constant 32 : i32
    %135 = tpu.dynamic_rotate %128 by %c32_i32_72 dim 1 : vector<32x128xf32>, i32 -> vector<32x128xf32>
    %136 = arith.addf %131, %135 : vector<32x128xf32>
    %c64_i32_73 = arith.constant 64 : i32
    %137 = tpu.dynamic_rotate %134 by %c64_i32_73 dim 1 : vector<32x128xf32>, i32 -> vector<32x128xf32>
    %138 = arith.addf %136, %137 : vector<32x128xf32>
    %139 = arith.truncf %138 : vector<32x128xf32> to vector<32x128xbf16>
    %c5 = arith.constant 5 : index
    %c0_74 = arith.constant 0 : index
    %c0_75 = arith.constant 0 : index
    %140 = vector.load %arg2[%c5, %c0_74, %c0_75] : memref<7x128x128xbf16, #tpu.memory_space<vmem>>, vector<1x128x128xbf16>
    %141 = vector.shape_cast %140 : vector<1x128x128xbf16> to vector<128x128xbf16>
    %cst_76 = arith.constant dense<0.000000e+00> : vector<32x128xf32>
    %142 = tpu.matmul %139, %141, %cst_76 {dimension_numbers = #tpu.dot_dimension_numbers<[1], [0], [0], [1], [0, 0, 1, 1], [], []>} : vector<32x128xbf16>, vector<128x128xbf16>, vector<32x128xf32> -> vector<32x128xf32>
    %c5_77 = arith.constant 5 : index
    %c0_78 = arith.constant 0 : index
    %c0_79 = arith.constant 0 : index
    %143 = vector.load %arg3[%c5_77, %c0_78, %c0_79] : memref<7x1x128xf32, #tpu.memory_space<vmem>>, vector<1x1x128xf32>
    %144 = vector.shape_cast %143 : vector<1x1x128xf32> to vector<1x128xf32>
    %145 = vector.broadcast %144 : vector<1x128xf32> to vector<32x128xf32>
    %146 = arith.addf %142, %145 : vector<32x128xf32>
    %cst_80 = arith.constant 0.000000e+00 : f32
    %147 = vector.broadcast %cst_80 : f32 to vector<32x128xf32>
    %148 = arith.cmpf ogt, %146, %147 : vector<32x128xf32>
    %cst_81 = arith.constant 2.000000e-01 : f32
    %149 = vector.broadcast %cst_81 : f32 to vector<32x128xf32>
    %150 = arith.mulf %149, %146 : vector<32x128xf32>
    %151 = arith.select %148, %146, %150 : vector<32x128xi1>, vector<32x128xf32>
    %c1_i32_82 = arith.constant 1 : i32
    %152 = tpu.dynamic_rotate %151 by %c1_i32_82 dim 0 : vector<32x128xf32>, i32 -> vector<32x128xf32>
    %cst_83 = arith.constant 0.000000e+00 : f32
    %153 = vector.broadcast %cst_83 : f32 to vector<32x128xf32>
    %154 = arith.select %18, %152, %153 : vector<32x128xi1>, vector<32x128xf32>
    %c31_i32_84 = arith.constant 31 : i32
    %155 = tpu.dynamic_rotate %151 by %c31_i32_84 dim 0 : vector<32x128xf32>, i32 -> vector<32x128xf32>
    %cst_85 = arith.constant 0.000000e+00 : f32
    %156 = vector.broadcast %cst_85 : f32 to vector<32x128xf32>
    %157 = arith.select %20, %155, %156 : vector<32x128xi1>, vector<32x128xf32>
    %c32_i32_86 = arith.constant 32 : i32
    %158 = tpu.dynamic_rotate %151 by %c32_i32_86 dim 1 : vector<32x128xf32>, i32 -> vector<32x128xf32>
    %159 = arith.addf %154, %158 : vector<32x128xf32>
    %c64_i32_87 = arith.constant 64 : i32
    %160 = tpu.dynamic_rotate %157 by %c64_i32_87 dim 1 : vector<32x128xf32>, i32 -> vector<32x128xf32>
    %161 = arith.addf %159, %160 : vector<32x128xf32>
    %162 = arith.truncf %161 : vector<32x128xf32> to vector<32x128xbf16>
    %c6 = arith.constant 6 : index
    %c0_88 = arith.constant 0 : index
    %c0_89 = arith.constant 0 : index
    %163 = vector.load %arg2[%c6, %c0_88, %c0_89] : memref<7x128x128xbf16, #tpu.memory_space<vmem>>, vector<1x128x128xbf16>
    %164 = vector.shape_cast %163 : vector<1x128x128xbf16> to vector<128x128xbf16>
    %cst_90 = arith.constant dense<0.000000e+00> : vector<32x128xf32>
    %165 = tpu.matmul %162, %164, %cst_90 {dimension_numbers = #tpu.dot_dimension_numbers<[1], [0], [0], [1], [0, 0, 1, 1], [], []>} : vector<32x128xbf16>, vector<128x128xbf16>, vector<32x128xf32> -> vector<32x128xf32>
    %c6_91 = arith.constant 6 : index
    %c0_92 = arith.constant 0 : index
    %c0_93 = arith.constant 0 : index
    %166 = vector.load %arg3[%c6_91, %c0_92, %c0_93] : memref<7x1x128xf32, #tpu.memory_space<vmem>>, vector<1x1x128xf32>
    %167 = vector.shape_cast %166 : vector<1x1x128xf32> to vector<1x128xf32>
    %168 = vector.broadcast %167 : vector<1x128xf32> to vector<32x128xf32>
    %169 = arith.addf %165, %168 : vector<32x128xf32>
    %c0_94 = arith.constant 0 : index
    %c0_95 = arith.constant 0 : index
    %170 = vector.load %arg4[%c0_94, %c0_95] : memref<32x128xf32, #tpu.memory_space<vmem>>, vector<32x128xf32>
    tpu.vector_store %arg4[%c0_94, %c0_95], %169 {strides = array<i32>} : memref<32x128xf32, #tpu.memory_space<vmem>>, vector<32x128xf32>,
    return
  }
  func.func @transform_0(%arg0: i32) -> (i32, i32) {
    %c0_i32 = arith.constant 0 : i32
    %c0_i32_0 = arith.constant 0 : i32
    return %arg0, %c0_i32 : i32, i32
  }
  func.func @transform_1(%arg0: i32) -> (i32, i32, i32) {
    %c0_i32 = arith.constant 0 : i32
    %c0_i32_0 = arith.constant 0 : i32
    %c0_i32_1 = arith.constant 0 : i32
    %c0_i32_2 = arith.constant 0 : i32
    return %c0_i32, %c0_i32_0, %c0_i32_1 : i32, i32, i32
  }
  func.func @transform_2(%arg0: i32) -> (i32, i32, i32) {
    %c0_i32 = arith.constant 0 : i32
    %c0_i32_0 = arith.constant 0 : i32
    %c0_i32_1 = arith.constant 0 : i32
    %c0_i32_2 = arith.constant 0 : i32
    return %c0_i32, %c0_i32_0, %c0_i32_1 : i32, i32, i32
  }
  func.func @transform_3(%arg0: i32) -> (i32, i32) {
    %c0_i32 = arith.constant 0 : i32
    %c0_i32_0 = arith.constant 0 : i32
    return %arg0, %c0_i32 : i32, i32
  }
}

</mosaic_0001>

<bundles_post_ra>
// kernel: tpu_custom_call.1
= control target key start
LH: loop header
LB: loop body
LE: loop exit
PB: predicated region body
PF: predicated region fallthrough
CT: control target
= control target key end

     0   :  { %8 = vsyncpa [#allocation3], 0  ;;  %s2177_s0 = inlined_call_operand.hbm [shape: f32[32,128], index: 0, kind: input, shape index: {}]   ;;  %s2178_s1 = inlined_call_operand.hbm [shape: bf16[7,128,128], index: 1, kind: input, shape index: {}]   ;;  %s2179_s2 = inlined_call_operand.hbm [shape: f32[7,1,128], index: 2, kind: input, shape index: {}]   ;;  %s2180_s3 = inlined_call_operand.hbm [shape: f32[32,128], index: 3, kind: output, shape index: {}]  }
   0x1   :  { %9 = vsyncpa [#allocation6], 0 }
   0x2   :  { %10 = vsyncpa [#allocation4], 0  ;;  %s1830_s12 = smov [#allocation5]  }
   0x3   :  { %s28_s13 = sshll.u32 %s1830_s12, 4  ;;  %s29_s13 = int_to_ptr.vmem [resolvable:$true] %s28_s13 }
   0x4   :  { %s1752_s14 = scalar_lea.vmem %s29_s13, 7168  ;;  %p1757_p1 = scmp.lt.s32.totalorder %s29_s13, %s29_s13 }
   0x5   :  { %p1753_p0 = scmp.ne.s32.totalorder %s29_s13, %s1752_s14  ;;  %p1758_p2 = scmp.lt.s32.totalorder %s1752_s14, %s1752_s14 }
   0x7   :  { %p1759_p3 = por %p1758_p2, %p1757_p1 }
   0x9   :  { %p1760_p4 = pnand %p1759_p3, %p1753_p0 }
   0xb   :  { %1763 = shalt.err (!%p1760_p4)
}
   0xc   :  { %s1831_s15 = smov 64   ;;  %s1832_s16 = smov 4  }
   0xd   :  { %34 = dma.hbm_to_vmem [thread:$0]  %s2178_s1, 7168, %s29_s13, [#allocation6], %s1831_s15, %s1831_s15, %s1832_s16  }
   0xe   :  { %s1833_s19 = smov [#allocation2]  }
   0xf   :  { %s16_s20 = sshll.u32 %s1833_s19, 4  ;;  %s17_s20 = int_to_ptr.vmem [resolvable:$true] %s16_s20 }
  0x10   :  { %s1772_s21 = scalar_lea.vmem %s17_s20, 512  ;;  %p1777_p6 = scmp.lt.s32.totalorder %s17_s20, %s17_s20 }
  0x11   :  { %p1773_p5 = scmp.ne.s32.totalorder %s17_s20, %s1772_s21  ;;  %p1778_p7 = scmp.lt.s32.totalorder %s1772_s21, %s1772_s21 }
  0x13   :  { %p1779_p8 = por %p1778_p7, %p1777_p6 }
  0x15   :  { %p1780_p9 = pnand %p1779_p8, %p1773_p5 }
  0x17   :  { %1783 = shalt.err (!%p1780_p9)
}
  0x18   :  { %s1834_s22 = smov 128   ;;  %s1835_s23 = smov 8  }
  0x19   :  { %22 = dma.hbm_to_vmem [thread:$0]  %s2177_s0, 512, %s17_s20, [#allocation3], %s1834_s22, %s1834_s22, %s1835_s23  }
  0x1a   :  { %s1836_s1 = smov [#allocation7]  }
  0x1b   :  { %s40_s26 = sshll.u32 %s1836_s1, 4  ;;  %s41_s26 = int_to_ptr.vmem [resolvable:$true] %s40_s26 }
  0x1c   :  { %s1792_s27 = scalar_lea.vmem %s41_s26, 112  ;;  %s1796_s28 = scalar_lea.vmem %s41_s26, 128 }
  0x1d   :  { %p1793_p10 = scmp.ne.s32.totalorder %s41_s26, %s1792_s27  ;;  %p1797_p11 = scmp.lt.s32.totalorder %s41_s26, %s41_s26 }
  0x1e   :  { %p1798_p12 = scmp.lt.s32.totalorder %s1796_s28, %s1792_s27 }
  0x20   :  { %p1799_p13 = por %p1798_p12, %p1797_p11 }
  0x22   :  { %p1800_p0 = pnand %p1799_p13, %p1793_p10 }
  0x24   :  { %1803 = shalt.err (!%p1800_p0)
}
  0x25   :  { %s1837_s29 = smov 16   ;;  %s1838_s30 = smov 1  }
  0x26   :  { %46 = dma.hbm_to_vmem [thread:$0]  %s2179_s2, 112, %s41_s26, [#allocation6], %s1837_s29, %s1837_s29, %s1838_s30  }
  0x27   :  { %1824 = dma.done.wait [#allocation3], 512  }
  0x28   :  { %1825 = vsyncadd [#allocation3], 4294966784 }
  0x29   :  { %1826 = dma.done.wait [#allocation6], 7280  }
  0x2a   :  { %1827 = vsyncadd [#allocation6], 4294960016  ;;  %v57_v0 = vlaneseq  ;;  %v1879_v5 = vld [vmem:[#allocation2 + $0x10] sm:$0xff]  ;;  %v1881_v6 = vld [vmem:[#allocation2] sm:$0xff]  ;;  %s1839_s0 = smov 32   ;;  %s1840_s2 = smov [#allocation8]  }
  0x2b   :  { %152 = vrot.lane.b32.xlu1 %v1879_v5, %s1839_s0  ;;  %148 = vrot.lane.b32.xlu0 %v1881_v6, %s1839_s0  ;;  %v1888_v7 = vld [vmem:[#allocation2 + $0x18] sm:$0xff]  ;;  %v1890_v8 = vld [vmem:[#allocation2 + $0x8] sm:$0xff]  ;;  %v137_v9 = vrot.slane %v1879_v5, 1  ;;  %v135_v10 = vrot.slane %v1881_v6, 1  ;;  %v1689_v16 = vld [vmem:[#allocation5 + $0x30] sm:$0xff]   ;;  %v122_v33 = vrot.slane %v1881_v6, 7 }
  0x2c   :  { %v1875_v1 = vshrl.u32 %v57_v0, 7  ;;  %v1688_v12 = vld [vmem:[#allocation5 + $0x38] sm:$0xff]   ;;  %v136_v13 = vrot.slane %v1890_v8, 1  ;;  %v138_v14 = vrot.slane %v1888_v7, 1  ;;  %v1690_v22 = vld [vmem:[#allocation5 + $0x28] sm:$0xff]   ;;  %v1691_v24 = vld [vmem:[#allocation5 + $0x20] sm:$0xff]  }
  0x2d   :  { %1537 = vmatprep.subr.bf16.mxu0 %v1688_v12  ;;  %v1692_v26 = vld [vmem:[#allocation5 + $0x18] sm:$0xff]   ;;  %v1693_v27 = vld [vmem:[#allocation5 + $0x10] sm:$0xff]   ;;  %v1694_v28 = vld [vmem:[#allocation5 + $0x8] sm:$0xff]   ;;  %v125_v32 = vrot.slane %v1888_v7, 7  ;;  %v123_v37 = vrot.slane %v1890_v8, 7  ;;  %v124_v38 = vrot.slane %v1879_v5, 7 }
  0x2e   :  { %v59_v2 = vadd.s32 8, %v1875_v1  ;;  %v61_v3 = vadd.s32 24, %v1875_v1  ;;  %vm139_vm0 = vcmp.lt.s32.totalorder %v1875_v1, 7  ;;  %1538 = vmatpush3.bf16.msra.mxu0 %v1688_v12  ;;  %v1695_v29 = vld [vmem:[#allocation5] sm:$0xff]   ;;  %v60_v30 = vadd.s32 16, %v1875_v1  ;;  %v1696_v63 = vld [vmem:[#allocation5 + $0x78] sm:$0xff]  }
  0x2f   :  { %v141_v17 = vsel %vm139_vm0, %v136_v13, %v137_v9  ;;  %154 = vrot.lane.b32.xlu1 %v1888_v7, %s1839_s0  ;;  %150 = vrot.lane.b32.xlu0 %v1890_v8, %s1839_s0  ;;  %v142_v19 = vsel %vm139_vm0, %v135_v10, %v136_v13  ;;  %v143_v21 = vsel %vm139_vm0, %v138_v14, %v135_v10  ;;  %v66_v31 = vand.u32 15, %v1875_v1  ;;  %v1697_v0 = vld [vmem:[#allocation5 + $0x70] sm:$0xff]   ;;  %v1458_v39 = vld [vmem:[#allocation7 + $0x6] ss:$0 sm:$0xff]  ;;  %s1391_s6 = sshll.u32 %s1840_s2, 4  ;;  %s1392_s6 = int_to_ptr.vmem [resolvable:$true] %s1391_s6 }
  0x30   :  { %v73_v4 = vand.u32 15, %v59_v2  ;;  %v87_v11 = vand.u32 15, %v61_v3  ;;  %1539 = vmatprep.subr.bf16.mxu0 %v1689_v16  ;;  %v140_v25 = vsel %vm139_vm0, %v137_v9, %v138_v14  ;;  %vm126_vm3 = vcmp.lt.s32.totalorder %v1875_v1, 1  ;;  %1557 = vmatprep.subr.bf16.mxu1 %v1696_v63  ;;  %v1698_v2 = vld [vmem:[#allocation5 + $0x68] sm:$0xff]   ;;  %v1699_v3 = vld [vmem:[#allocation5 + $0x60] sm:$0xff]   ;;  %s1804_s7 = scalar_lea.vmem %s1392_s6, 512  ;;  %p1809_p2 = scmp.lt.s32.totalorder %s1392_s6, %s1392_s6 }
  0x31   :  { %v80_v34 = vand.u32 15, %v60_v30  ;;  %vm1931_vm4 = vcmp.ne.s32.totalorder %v66_v31, 0  ;;  %v130_v40 = vsel %vm126_vm3, %v125_v32, %v122_v33  ;;  %v129_v44 = vsel %vm126_vm3, %v122_v33, %v123_v37  ;;  %1558 = vmatpush3.bf16.msra.mxu1 %v1696_v63  ;;  %v1404_v9 = vld [vmem:[#allocation7] ss:$0 sm:$0xff]  ;;  %p1805_p1 = scmp.ne.s32.totalorder %s1392_s6, %s1804_s7  ;;  %p1810_p3 = scmp.lt.s32.totalorder %s1804_s7, %s1804_s7 }
  0x32   :  { %vm1896_vm1 = vcmp.ne.s32.totalorder %v73_v4, 15  ;;  %vm1910_vm2 = vcmp.ne.s32.totalorder %v87_v11, 15  ;;  %1540 = vmatpush3.bf16.msra.mxu0 %v1689_v16  ;;  %v131_v41 = vsel %vm1931_vm4, %v130_v40, 0.0  ;;  %v128_v46 = vsel %vm126_vm3, %v123_v37, %v124_v38  ;;  %1559 = vmatprep.subr.bf16.mxu1 %v1697_v0  ;;  %v1700_v4 = vld [vmem:[#allocation5 + $0x58] sm:$0xff]   ;;  %v1701_v11 = vld [vmem:[#allocation5 + $0x50] sm:$0xff]  }
  0x33   :  { %v145_v18 = vsel %vm1896_vm1, %v141_v17, 0.0  ;;  %160 = vrot.lane.b32.xlu0 %v142_v19, %s1831_s15  ;;  %v147_v23 = vsel %vm1910_vm2, %v143_v21, 0.0  ;;  %1541 = vmatprep.subr.bf16.mxu0 %v1690_v22  ;;  %vm1941_vm5 = vcmp.ne.s32.totalorder %v80_v34, 0  ;;  %v127_v50 = vsel %vm126_vm3, %v124_v38, %v125_v32  ;;  %p1811_p4 = por %p1810_p3, %p1809_p2 }
  0x34   :  { %162 = vrot.lane.b32.xlu1 %v145_v18, %s1831_s15  ;;  %v133_v49 = vsel %vm1941_vm5, %v128_v46, 0.0  ;;  %v1702_v18 = vld [vmem:[#allocation5 + $0x48] sm:$0xff]  }
  0x35   :  { %1560 = vmatpush3.bf16.msra.mxu1 %v1697_v0  ;;  %p1812_p5 = pnand %p1811_p4, %p1805_p1 }
  0x36   :  { %1542 = vmatpush3.bf16.msra.mxu0 %v1690_v22  ;;  %1561 = vmatprep.subr.bf16.mxu1 %v1698_v2 }
  0x37   :  { %164 = vrot.lane.b32.xlu0 %v140_v25, %s1831_s15  ;;  %1543 = vmatprep.subr.bf16.mxu0 %v1691_v24 }
  0x38   :  { %166 = vrot.lane.b32.xlu1 %v147_v23, %s1831_s15 }
  0x39   :  { %1562 = vmatpush3.bf16.msra.mxu1 %v1698_v2 }
  0x3a   :  { %1544 = vmatpush3.bf16.msra.mxu0 %v1691_v24  ;;  %1563 = vmatprep.subr.bf16.mxu1 %v1699_v3 }
  0x3b   :  { %1545 = vmatprep.subr.bf16.mxu0 %v1692_v26 }
  0x3d   :  { %1564 = vmatpush3.bf16.msra.mxu1 %v1699_v3 }
  0x3e   :  { %1546 = vmatpush3.bf16.msra.mxu0 %v1692_v26  ;;  %1565 = vmatprep.subr.bf16.mxu1 %v1700_v4 }
  0x3f   :  { %1547 = vmatprep.subr.bf16.mxu0 %v1693_v27 }
  0x41   :  { %1566 = vmatpush3.bf16.msra.mxu1 %v1700_v4 }
  0x42   :  { %1548 = vmatpush3.bf16.msra.mxu0 %v1693_v27  ;;  %1567 = vmatprep.subr.bf16.mxu1 %v1701_v11  ;;  %v1703_v27 = vld [vmem:[#allocation5 + $0x40] sm:$0xff]  }
  0x43   :  { %1549 = vmatprep.subr.bf16.mxu0 %v1694_v28 }
  0x45   :  { %1568 = vmatpush3.bf16.msra.mxu1 %v1701_v11 }
  0x46   :  { %1550 = vmatpush3.bf16.msra.mxu0 %v1694_v28  ;;  %1569 = vmatprep.subr.bf16.mxu1 %v1702_v18 }
  0x47   :  { %1551 = vmatprep.subr.bf16.mxu0 %v1695_v29 }
  0x49   :  { %1570 = vmatpush3.bf16.msra.mxu1 %v1702_v18  ;;  %v1413_v18 = vld [vmem:[#allocation7 + $0x1] ss:$0 sm:$0xff] }
  0x4a   :  { %1552 = vmatpush3.bf16.msra.mxu0 %v1695_v29  ;;  %1571 = vmatprep.subr.bf16.mxu1 %v1703_v27 }
  0x4d   :  { %1572 = vmatpush3.bf16.msra.mxu1 %v1703_v27 }
  0x9d   :  { %v153_v35 = vpop.permute.xlu1 %152  ;;  %v149_v36 = vpop.permute.xlu0 %148 }
  0x9e   :  { %v156_v47 = vadd.f32 %v149_v36, %v131_v41  ;;  %v158_v55 = vadd.f32 %v153_v35, %v133_v49 }
  0xa1   :  { %v155_v42 = vpop.permute.xlu1 %154  ;;  %v151_v43 = vpop.permute.xlu0 %150 }
  0xa2   :  { %v157_v48 = vadd.f32 %v151_v43, %v129_v44  ;;  %v159_v56 = vadd.f32 %v155_v42, %v127_v50 }
  0xa5   :  { %v161_v52 = vpop.permute.xlu0 %160 }
  0xa6   :  { %v163_v51 = vpop.permute.xlu1 %162  ;;  %v168_v54 = vadd.f32 %v161_v52, %v156_v47 }
  0xa7   :  { %v169_v53 = vadd.f32 %v163_v51, %v157_v48 }
  0xa9   :  { %v172_v57 = vpack.c.bf16 %v169_v53, %v168_v54  ;;  %v165_v59 = vpop.permute.xlu0 %164 }
  0xaa   :  { %v167_v58 = vpop.permute.xlu1 %166  ;;  %v170_v61 = vadd.f32 %v165_v59, %v158_v55 }
  0xab   :  { %v171_v60 = vadd.f32 %v167_v58, %v159_v56  ;;  %1553 = vmatprep.mubr.bf16.mxu0 %v172_v57 }
  0xad   :  { %v173_v62 = vpack.c.bf16 %v171_v60, %v170_v61 }
  0xaf   :  { %1554 = vmatmul.mubr.bf16.vlgmr.msra.gmra.mxu0 %v173_v62 }
 0x16f   :  { %v1555_v10 = vpop.f32.mrf.mxu0 }
 0x170   :  { %v288_v12 = vadd.f32 %v1555_v10, %v1404_v9 }
 0x171   :  { %v279_v13 = vpop.f32.mrf.mxu0 }
 0x172   :  { %v300_v14 = vmul.f32 0.2, %v288_v12  ;;  %v280_v16 = vadd.f32 %v1404_v9, %v279_v13  ;;  %vm296_vm6 = vcmp.gt.f32.partialorder %v288_v12, 0.0  ;;  %v1705_v13 = vld [vmem:[#allocation5 + $0xb0] sm:$0xff]  }
 0x173   :  { %v1556_v17 = vpop.f32.mrf.mxu0 }
 0x174   :  { %v298_v19 = vmul.f32 0.2, %v280_v16  ;;  %v291_v21 = vadd.f32 %v1556_v17, %v1404_v9  ;;  %v304_v22 = vsel %vm296_vm6, %v288_v12, %v300_v14  ;;  %vm294_vm7 = vcmp.gt.f32.partialorder %v280_v16, 0.0  ;;  %v1704_v12 = vld [vmem:[#allocation5 + $0xb8] sm:$0xff]   ;;  %v1706_v14 = vld [vmem:[#allocation5 + $0xa8] sm:$0xff]  }
 0x175   :  { %334 = vrot.lane.b32.xlu0 %v304_v22, %s1839_s0  ;;  %v282_v23 = vpop.f32.mrf.mxu0  ;;  %v308_v31 = vrot.slane %v304_v22, 7  ;;  %v320_v34 = vrot.slane %v304_v22, 1  ;;  %1577 = vmatprep.subr.bf16.mxu0 %v1704_v12  ;;  %v1708_v17 = vld [vmem:[#allocation5 + $0x98] sm:$0xff]  }
 0x176   :  { %v301_v24 = vmul.f32 0.2, %v291_v21  ;;  %v283_v25 = vadd.f32 %v1404_v9, %v282_v23  ;;  %vm297_vm8 = vcmp.gt.f32.partialorder %v291_v21, 0.0  ;;  %v302_v26 = vsel %vm294_vm7, %v280_v16, %v298_v19  ;;  %1578 = vmatpush3.bf16.msra.mxu0 %v1704_v12  ;;  %v1707_v16 = vld [vmem:[#allocation5 + $0xa0] sm:$0xff]   ;;  %v1709_v19 = vld [vmem:[#allocation5 + $0x90] sm:$0xff]   ;;  %v1712_v12 = vld [vmem:[#allocation5 + $0xf8] sm:$0xff]  }
 0x177   :  { %v306_v32 = vrot.slane %v302_v26, 7  ;;  %v318_v35 = vrot.slane %v302_v26, 1  ;;  %1579 = vmatprep.subr.bf16.mxu0 %v1705_v13  ;;  %1597 = vmatprep.subr.bf16.mxu1 %v1712_v12 }
 0x178   :  { %v299_v28 = vmul.f32 0.2, %v283_v25  ;;  %v305_v29 = vsel %vm297_vm8, %v291_v21, %v301_v24  ;;  %vm295_vm9 = vcmp.gt.f32.partialorder %v283_v25, 0.0 }
 0x179   :  { %336 = vrot.lane.b32.xlu1 %v305_v29, %s1839_s0  ;;  %v309_v30 = vrot.slane %v305_v29, 7  ;;  %330 = vrot.lane.b32.xlu0 %v302_v26, %s1839_s0  ;;  %v321_v41 = vrot.slane %v305_v29, 1  ;;  %v1710_v26 = vld [vmem:[#allocation5 + $0x88] sm:$0xff]  }
 0x17a   :  { %v303_v33 = vsel %vm295_vm9, %v283_v25, %v299_v28  ;;  %1580 = vmatpush3.bf16.msra.mxu0 %v1705_v13  ;;  %v1713_v13 = vld [vmem:[#allocation5 + $0xf0] sm:$0xff]  }
 0x17b   :  { %v307_v36 = vrot.slane %v303_v33, 7  ;;  %v319_v37 = vrot.slane %v303_v33, 1  ;;  %v310_v38 = vsel %vm126_vm3, %v308_v31, %v309_v30  ;;  %v313_v40 = vsel %vm126_vm3, %v309_v30, %v306_v32  ;;  %1581 = vmatprep.subr.bf16.mxu0 %v1706_v14 }
 0x17c   :  { %v322_v48 = vsel %vm139_vm0, %v320_v34, %v321_v41  ;;  %v325_v49 = vsel %vm139_vm0, %v321_v41, %v318_v35  ;;  %v314_v56 = vsel %vm1931_vm4, %v313_v40, 0.0 }
 0x17d   :  { %332 = vrot.lane.b32.xlu1 %v303_v33, %s1839_s0  ;;  %v324_v42 = vsel %vm139_vm0, %v318_v35, %v319_v37  ;;  %v323_v43 = vsel %vm139_vm0, %v319_v37, %v320_v34  ;;  %v311_v44 = vsel %vm126_vm3, %v307_v36, %v308_v31  ;;  %v312_v46 = vsel %vm126_vm3, %v306_v32, %v307_v36  ;;  %v1711_v33 = vld [vmem:[#allocation5 + $0x80] sm:$0xff]  }
 0x17e   :  { %342 = vrot.lane.b32.xlu0 %v324_v42, %s1831_s15  ;;  %v327_v47 = vsel %vm1896_vm1, %v323_v43, 0.0  ;;  %v329_v50 = vsel %vm1910_vm2, %v325_v49, 0.0  ;;  %v316_v62 = vsel %vm1941_vm5, %v311_v44, 0.0  ;;  %1582 = vmatpush3.bf16.msra.mxu0 %v1706_v14  ;;  %v1714_v14 = vld [vmem:[#allocation5 + $0xe8] sm:$0xff]  }
 0x17f   :  { %1583 = vmatprep.subr.bf16.mxu0 %v1707_v16 }
 0x181   :  { %344 = vrot.lane.b32.xlu1 %v327_v47, %s1831_s15 }
 0x182   :  { %346 = vrot.lane.b32.xlu0 %v322_v48, %s1831_s15  ;;  %1584 = vmatpush3.bf16.msra.mxu0 %v1707_v16  ;;  %v1715_v16 = vld [vmem:[#allocation5 + $0xe0] sm:$0xff]  }
 0x183   :  { %1585 = vmatprep.subr.bf16.mxu0 %v1708_v17 }
 0x185   :  { %348 = vrot.lane.b32.xlu1 %v329_v50, %s1831_s15 }
 0x186   :  { %1586 = vmatpush3.bf16.msra.mxu0 %v1708_v17  ;;  %v1716_v17 = vld [vmem:[#allocation5 + $0xd8] sm:$0xff]  }
 0x187   :  { %1587 = vmatprep.subr.bf16.mxu0 %v1709_v19 }
 0x18a   :  { %1588 = vmatpush3.bf16.msra.mxu0 %v1709_v19 }
 0x18b   :  { %1589 = vmatprep.subr.bf16.mxu0 %v1710_v26 }
 0x18e   :  { %1590 = vmatpush3.bf16.msra.mxu0 %v1710_v26 }
 0x18f   :  { %1591 = vmatprep.subr.bf16.mxu0 %v1711_v33 }
 0x192   :  { %1592 = vmatpush3.bf16.msra.mxu0 %v1711_v33 }
 0x1e7   :  { %v335_v51 = vpop.permute.xlu0 %334 }
 0x1e8   :  { %v340_v0 = vadd.f32 %v335_v51, %v316_v62 }
 0x1eb   :  { %v337_v52 = vpop.permute.xlu1 %336  ;;  %v331_v53 = vpop.permute.xlu0 %330 }
 0x1ec   :  { %v338_v57 = vadd.f32 %v331_v53, %v314_v56  ;;  %v341_v2 = vadd.f32 %v337_v52, %v310_v38 }
 0x1ef   :  { %v333_v54 = vpop.permute.xlu1 %332 }
 0x1f0   :  { %v343_v55 = vpop.permute.xlu0 %342  ;;  %v339_v58 = vadd.f32 %v333_v54, %v312_v46 }
 0x1f1   :  { %v350_v60 = vadd.f32 %v343_v55, %v338_v57 }
 0x1f3   :  { %v345_v59 = vpop.permute.xlu1 %344 }
 0x1f4   :  { %v351_v61 = vadd.f32 %v345_v59, %v339_v58  ;;  %v347_v63 = vpop.permute.xlu0 %346 }
 0x1f5   :  { %v352_v9 = vadd.f32 %v347_v63, %v340_v0 }
 0x1f6   :  { %v354_v3 = vpack.c.bf16 %v351_v61, %v350_v60 }
 0x1f7   :  { %v349_v4 = vpop.permute.xlu1 %348 }
 0x1f8   :  { %v353_v10 = vadd.f32 %v349_v4, %v341_v2  ;;  %1573 = vmatprep.mubr.bf16.mxu1 %v354_v3 }
 0x1fa   :  { %v355_v11 = vpack.c.bf16 %v353_v10, %v352_v9 }
 0x1fc   :  { %1574 = vmatmul.mubr.bf16.vlgmr.msra.gmra.mxu1 %v355_v11 }
 0x1fd   :  { %1598 = vmatpush3.bf16.msra.mxu1 %v1712_v12 }
 0x1fe   :  { %1599 = vmatprep.subr.bf16.mxu1 %v1713_v13 }
 0x201   :  { %1600 = vmatpush3.bf16.msra.mxu1 %v1713_v13 }
 0x202   :  { %1601 = vmatprep.subr.bf16.mxu1 %v1714_v14 }
 0x205   :  { %1602 = vmatpush3.bf16.msra.mxu1 %v1714_v14 }
 0x206   :  { %1603 = vmatprep.subr.bf16.mxu1 %v1715_v16 }
 0x209   :  { %1604 = vmatpush3.bf16.msra.mxu1 %v1715_v16 }
 0x20a   :  { %1605 = vmatprep.subr.bf16.mxu1 %v1716_v17 }
 0x20d   :  { %1606 = vmatpush3.bf16.msra.mxu1 %v1716_v17 }
 0x2bc   :  { %v1575_v21 = vpop.f32.mrf.mxu1 }
 0x2bd   :  { %v472_v22 = vadd.f32 %v1575_v21, %v1413_v18  ;;  %v1717_v21 = vld [vmem:[#allocation5 + $0xd0] sm:$0xff]  }
 0x2be   :  { %v463_v23 = vpop.f32.mrf.mxu1  ;;  %1607 = vmatprep.subr.bf16.mxu1 %v1717_v21 }
 0x2bf   :  { %v1984_v24 = vadd.f32 %v472_v22, %v1879_v5  ;;  %v464_v25 = vadd.f32 %v1413_v18, %v463_v23  ;;  %1608 = vmatpush3.bf16.msra.mxu1 %v1717_v21 }
 0x2c0   :  { %v1576_v27 = vpop.f32.mrf.mxu1 }
 0x2c1   :  { %v475_v28 = vadd.f32 %v1576_v27, %v1413_v18  ;;  %510 = vrot.lane.b32.xlu0 %v1984_v24, %s1839_s0  ;;  %v1989_v30 = vadd.f32 %v464_v25, %v1881_v6  ;;  %v496_v35 = vrot.slane %v1984_v24, 1  ;;  %v484_v51 = vrot.slane %v1984_v24, 7 }
 0x2c2   :  { %v466_v29 = vpop.f32.mrf.mxu1 }
 0x2c3   :  { %v1992_v31 = vadd.f32 %v475_v28, %v1888_v7  ;;  %v467_v32 = vadd.f32 %v1413_v18, %v466_v29  ;;  %v494_v34 = vrot.slane %v1989_v30, 1  ;;  %v482_v47 = vrot.slane %v1989_v30, 7  ;;  %v1422_v18 = vld [vmem:[#allocation7 + $0x2] ss:$0 sm:$0xff]  ;;  %v1718_v28 = vld [vmem:[#allocation5 + $0xc8] sm:$0xff]  }
 0x2c4   :  { %1609 = vmatprep.subr.bf16.mxu1 %v1718_v28 }
 0x2c5   :  { %v1995_v5 = vadd.f32 %v467_v32, %v1890_v8  ;;  %512 = vrot.lane.b32.xlu1 %v1992_v31, %s1839_s0  ;;  %506 = vrot.lane.b32.xlu0 %v1989_v30, %s1839_s0  ;;  %v497_v36 = vrot.slane %v1992_v31, 1  ;;  %v485_v43 = vrot.slane %v1992_v31, 7 }
 0x2c6   :  { %1610 = vmatpush3.bf16.msra.mxu1 %v1718_v28  ;;  %v1431_v28 = vld [vmem:[#allocation7 + $0x3] ss:$0 sm:$0xff] }
 0x2c7   :  { %v495_v6 = vrot.slane %v1995_v5, 1  ;;  %v498_v38 = vsel %vm139_vm0, %v496_v35, %v497_v36  ;;  %v501_v40 = vsel %vm139_vm0, %v497_v36, %v494_v34  ;;  %v483_v48 = vrot.slane %v1995_v5, 7 }
 0x2c8   :  { %v505_v41 = vsel %vm1910_vm2, %v501_v40, 0.0  ;;  %v489_v49 = vsel %vm126_vm3, %v485_v43, %v482_v47  ;;  %v486_v62 = vsel %vm126_vm3, %v484_v51, %v485_v43 }
 0x2c9   :  { %508 = vrot.lane.b32.xlu1 %v1995_v5, %s1839_s0  ;;  %v500_v7 = vsel %vm139_vm0, %v494_v34, %v495_v6  ;;  %v499_v8 = vsel %vm139_vm0, %v495_v6, %v496_v35  ;;  %v490_v53 = vsel %vm1931_vm4, %v489_v49, 0.0  ;;  %v488_v54 = vsel %vm126_vm3, %v482_v47, %v483_v48 }
 0x2ca   :  { %518 = vrot.lane.b32.xlu0 %v500_v7, %s1831_s15  ;;  %v503_v37 = vsel %vm1896_vm1, %v499_v8, 0.0  ;;  %v487_v55 = vsel %vm126_vm3, %v483_v48, %v484_v51  ;;  %v1719_v8 = vld [vmem:[#allocation5 + $0xc0] sm:$0xff]  }
 0x2cb   :  { %v492_v61 = vsel %vm1941_vm5, %v487_v55, 0.0  ;;  %1611 = vmatprep.subr.bf16.mxu1 %v1719_v8 }
 0x2cc   :  { %1612 = vmatpush3.bf16.msra.mxu1 %v1719_v8 }
 0x2cd   :  { %520 = vrot.lane.b32.xlu1 %v503_v37, %s1831_s15 }
 0x2ce   :  { %522 = vrot.lane.b32.xlu0 %v498_v38, %s1831_s15 }
 0x2d1   :  { %524 = vrot.lane.b32.xlu1 %v505_v41, %s1831_s15 }
 0x333   :  { %v511_v42 = vpop.permute.xlu0 %510 }
 0x334   :  { %v516_v0 = vadd.f32 %v511_v42, %v492_v61 }
 0x337   :  { %v513_v44 = vpop.permute.xlu1 %512  ;;  %v507_v46 = vpop.permute.xlu0 %506 }
 0x338   :  { %v514_v56 = vadd.f32 %v507_v46, %v490_v53  ;;  %v517_v2 = vadd.f32 %v513_v44, %v486_v62 }
 0x33b   :  { %v509_v50 = vpop.permute.xlu1 %508 }
 0x33c   :  { %v519_v52 = vpop.permute.xlu0 %518  ;;  %v515_v57 = vadd.f32 %v509_v50, %v488_v54 }
 0x33d   :  { %v526_v59 = vadd.f32 %v519_v52, %v514_v56 }
 0x33f   :  { %v521_v58 = vpop.permute.xlu1 %520 }
 0x340   :  { %v527_v60 = vadd.f32 %v521_v58, %v515_v57  ;;  %v523_v63 = vpop.permute.xlu0 %522 }
 0x341   :  { %v528_v9 = vadd.f32 %v523_v63, %v516_v0 }
 0x342   :  { %v530_v3 = vpack.c.bf16 %v527_v60, %v526_v59 }
 0x343   :  { %v525_v4 = vpop.permute.xlu1 %524 }
 0x344   :  { %v529_v10 = vadd.f32 %v525_v4, %v517_v2  ;;  %1593 = vmatprep.mubr.bf16.mxu0 %v530_v3 }
 0x346   :  { %v531_v11 = vpack.c.bf16 %v529_v10, %v528_v9 }
 0x348   :  { %1594 = vmatmul.mubr.bf16.vlgmr.msra.gmra.mxu0 %v531_v11 }
 0x408   :  { %v1595_v19 = vpop.f32.mrf.mxu0 }
 0x409   :  { %v648_v22 = vadd.f32 %v1595_v19, %v1422_v18 }
 0x40a   :  { %v639_v23 = vpop.f32.mrf.mxu0 }
 0x40b   :  { %v660_v25 = vmul.f32 0.2, %v648_v22  ;;  %v640_v26 = vadd.f32 %v1422_v18, %v639_v23  ;;  %vm656_vm10 = vcmp.gt.f32.partialorder %v648_v22, 0.0  ;;  %v1721_v23 = vld [vmem:[#allocation5 + $0x130] sm:$0xff]  }
 0x40c   :  { %v1596_v27 = vpop.f32.mrf.mxu0 }
 0x40d   :  { %v658_v29 = vmul.f32 0.2, %v640_v26  ;;  %v651_v32 = vadd.f32 %v1596_v27, %v1422_v18  ;;  %v664_v33 = vsel %vm656_vm10, %v648_v22, %v660_v25  ;;  %vm654_vm11 = vcmp.gt.f32.partialorder %v640_v26, 0.0  ;;  %v1720_v22 = vld [vmem:[#allocation5 + $0x138] sm:$0xff]   ;;  %v1722_v25 = vld [vmem:[#allocation5 + $0x128] sm:$0xff]  }
 0x40e   :  { %694 = vrot.lane.b32.xlu0 %v664_v33, %s1839_s0  ;;  %v642_v34 = vpop.f32.mrf.mxu0  ;;  %v668_v40 = vrot.slane %v664_v33, 7  ;;  %v680_v43 = vrot.slane %v664_v33, 1  ;;  %1617 = vmatprep.subr.bf16.mxu0 %v1720_v22  ;;  %v1724_v27 = vld [vmem:[#allocation5 + $0x118] sm:$0xff]  }
 0x40f   :  { %v661_v6 = vmul.f32 0.2, %v651_v32  ;;  %v643_v35 = vadd.f32 %v1422_v18, %v642_v34  ;;  %vm657_vm12 = vcmp.gt.f32.partialorder %v651_v32, 0.0  ;;  %v662_v7 = vsel %vm654_vm11, %v640_v26, %v658_v29  ;;  %1618 = vmatpush3.bf16.msra.mxu0 %v1720_v22  ;;  %v1723_v26 = vld [vmem:[#allocation5 + $0x120] sm:$0xff]   ;;  %v1725_v29 = vld [vmem:[#allocation5 + $0x110] sm:$0xff]   ;;  %v1728_v22 = vld [vmem:[#allocation5 + $0x178] sm:$0xff]  }
 0x410   :  { %v666_v41 = vrot.slane %v662_v7, 7  ;;  %v678_v44 = vrot.slane %v662_v7, 1  ;;  %1619 = vmatprep.subr.bf16.mxu0 %v1721_v23  ;;  %1637 = vmatprep.subr.bf16.mxu1 %v1728_v22 }
 0x411   :  { %v659_v36 = vmul.f32 0.2, %v643_v35  ;;  %v665_v37 = vsel %vm657_vm12, %v651_v32, %v661_v6  ;;  %vm655_vm13 = vcmp.gt.f32.partialorder %v643_v35, 0.0 }
 0x412   :  { %696 = vrot.lane.b32.xlu1 %v665_v37, %s1839_s0  ;;  %v669_v38 = vrot.slane %v665_v37, 7  ;;  %690 = vrot.lane.b32.xlu0 %v662_v7, %s1839_s0  ;;  %v681_v50 = vrot.slane %v665_v37, 1  ;;  %v1726_v7 = vld [vmem:[#allocation5 + $0x108] sm:$0xff]  }
 0x413   :  { %v663_v42 = vsel %vm655_vm13, %v643_v35, %v659_v36  ;;  %1620 = vmatpush3.bf16.msra.mxu0 %v1721_v23  ;;  %v1729_v23 = vld [vmem:[#allocation5 + $0x170] sm:$0xff]  }
 0x414   :  { %v667_v46 = vrot.slane %v663_v42, 7  ;;  %v679_v47 = vrot.slane %v663_v42, 1  ;;  %v670_v48 = vsel %vm126_vm3, %v668_v40, %v669_v38  ;;  %v673_v49 = vsel %vm126_vm3, %v669_v38, %v666_v41  ;;  %1621 = vmatprep.subr.bf16.mxu0 %v1722_v25 }
 0x415   :  { %v682_v56 = vsel %vm139_vm0, %v680_v43, %v681_v50  ;;  %v685_v57 = vsel %vm139_vm0, %v681_v50, %v678_v44  ;;  %v674_v0 = vsel %vm1931_vm4, %v673_v49, 0.0 }
 0x416   :  { %692 = vrot.lane.b32.xlu1 %v663_v42, %s1839_s0  ;;  %v684_v51 = vsel %vm139_vm0, %v678_v44, %v679_v47  ;;  %v683_v52 = vsel %vm139_vm0, %v679_v47, %v680_v43  ;;  %v671_v53 = vsel %vm126_vm3, %v667_v46, %v668_v40  ;;  %v672_v54 = vsel %vm126_vm3, %v666_v41, %v667_v46  ;;  %v1727_v42 = vld [vmem:[#allocation5 + $0x100] sm:$0xff]  }
 0x417   :  { %702 = vrot.lane.b32.xlu0 %v684_v51, %s1831_s15  ;;  %v687_v55 = vsel %vm1896_vm1, %v683_v52, 0.0  ;;  %v689_v58 = vsel %vm1910_vm2, %v685_v57, 0.0  ;;  %v676_v11 = vsel %vm1941_vm5, %v671_v53, 0.0  ;;  %1622 = vmatpush3.bf16.msra.mxu0 %v1722_v25  ;;  %v1730_v25 = vld [vmem:[#allocation5 + $0x168] sm:$0xff]  }
 0x418   :  { %1623 = vmatprep.subr.bf16.mxu0 %v1723_v26 }
 0x41a   :  { %704 = vrot.lane.b32.xlu1 %v687_v55, %s1831_s15 }
 0x41b   :  { %706 = vrot.lane.b32.xlu0 %v682_v56, %s1831_s15  ;;  %1624 = vmatpush3.bf16.msra.mxu0 %v1723_v26  ;;  %v1731_v26 = vld [vmem:[#allocation5 + $0x160] sm:$0xff]  }
 0x41c   :  { %1625 = vmatprep.subr.bf16.mxu0 %v1724_v27 }
 0x41e   :  { %708 = vrot.lane.b32.xlu1 %v689_v58, %s1831_s15 }
 0x41f   :  { %1626 = vmatpush3.bf16.msra.mxu0 %v1724_v27  ;;  %v1732_v27 = vld [vmem:[#allocation5 + $0x158] sm:$0xff]  }
 0x420   :  { %1627 = vmatprep.subr.bf16.mxu0 %v1725_v29 }
 0x423   :  { %1628 = vmatpush3.bf16.msra.mxu0 %v1725_v29 }
 0x424   :  { %1629 = vmatprep.subr.bf16.mxu0 %v1726_v7 }
 0x427   :  { %1630 = vmatpush3.bf16.msra.mxu0 %v1726_v7 }
 0x428   :  { %1631 = vmatprep.subr.bf16.mxu0 %v1727_v42 }
 0x42b   :  { %1632 = vmatpush3.bf16.msra.mxu0 %v1727_v42 }
 0x480   :  { %v695_v59 = vpop.permute.xlu0 %694 }
 0x481   :  { %v700_v13 = vadd.f32 %v695_v59, %v676_v11 }
 0x484   :  { %v697_v60 = vpop.permute.xlu1 %696  ;;  %v691_v61 = vpop.permute.xlu0 %690 }
 0x485   :  { %v698_v2 = vadd.f32 %v691_v61, %v674_v0  ;;  %v701_v14 = vadd.f32 %v697_v60, %v670_v48 }
 0x488   :  { %v693_v62 = vpop.permute.xlu1 %692 }
 0x489   :  { %v703_v63 = vpop.permute.xlu0 %702  ;;  %v699_v3 = vadd.f32 %v693_v62, %v672_v54 }
 0x48a   :  { %v710_v9 = vadd.f32 %v703_v63, %v698_v2 }
 0x48c   :  { %v705_v4 = vpop.permute.xlu1 %704 }
 0x48d   :  { %v711_v10 = vadd.f32 %v705_v4, %v699_v3  ;;  %v707_v12 = vpop.permute.xlu0 %706 }
 0x48e   :  { %v712_v18 = vadd.f32 %v707_v12, %v700_v13 }
 0x48f   :  { %v714_v16 = vpack.c.bf16 %v711_v10, %v710_v9 }
 0x490   :  { %v709_v17 = vpop.permute.xlu1 %708 }
 0x491   :  { %v713_v19 = vadd.f32 %v709_v17, %v701_v14  ;;  %1613 = vmatprep.mubr.bf16.mxu1 %v714_v16 }
 0x493   :  { %v715_v21 = vpack.c.bf16 %v713_v19, %v712_v18 }
 0x495   :  { %1614 = vmatmul.mubr.bf16.vlgmr.msra.gmra.mxu1 %v715_v21 }
 0x496   :  { %1638 = vmatpush3.bf16.msra.mxu1 %v1728_v22 }
 0x497   :  { %1639 = vmatprep.subr.bf16.mxu1 %v1729_v23 }
 0x49a   :  { %1640 = vmatpush3.bf16.msra.mxu1 %v1729_v23 }
 0x49b   :  { %1641 = vmatprep.subr.bf16.mxu1 %v1730_v25 }
 0x49e   :  { %1642 = vmatpush3.bf16.msra.mxu1 %v1730_v25 }
 0x49f   :  { %1643 = vmatprep.subr.bf16.mxu1 %v1731_v26 }
 0x4a2   :  { %1644 = vmatpush3.bf16.msra.mxu1 %v1731_v26 }
 0x4a3   :  { %1645 = vmatprep.subr.bf16.mxu1 %v1732_v27 }
 0x4a6   :  { %1646 = vmatpush3.bf16.msra.mxu1 %v1732_v27  ;;  %v1736_v27 = vld [vmem:[#allocation5 + $0x1b8] sm:$0xff]  }
 0x4a7   :  { %1657 = vmatprep.subr.bf16.mxu0 %v1736_v27 }
 0x555   :  { %v1615_v32 = vpop.f32.mrf.mxu1 }
 0x556   :  { %v832_v33 = vadd.f32 %v1615_v32, %v1431_v28  ;;  %v1733_v32 = vld [vmem:[#allocation5 + $0x150] sm:$0xff]  }
 0x557   :  { %v823_v34 = vpop.f32.mrf.mxu1  ;;  %1647 = vmatprep.subr.bf16.mxu1 %v1733_v32 }
 0x558   :  { %v840_v6 = vadd.f32 %v832_v33, %v1984_v24  ;;  %v824_v35 = vadd.f32 %v1431_v28, %v823_v34  ;;  %1648 = vmatpush3.bf16.msra.mxu1 %v1733_v32  ;;  %v1739_v32 = vld [vmem:[#allocation5 + $0x1a0] sm:$0xff]  }
 0x559   :  { %v1616_v8 = vpop.f32.mrf.mxu1 }
 0x55a   :  { %v835_v36 = vadd.f32 %v1616_v8, %v1431_v28  ;;  %870 = vrot.lane.b32.xlu0 %v840_v6, %s1839_s0  ;;  %v838_v37 = vadd.f32 %v824_v35, %v1989_v30  ;;  %v844_v44 = vrot.slane %v840_v6, 7  ;;  %v856_v49 = vrot.slane %v840_v6, 1  ;;  %v1734_v8 = vld [vmem:[#allocation5 + $0x148] sm:$0xff]  }
 0x55b   :  { %v826_v38 = vpop.f32.mrf.mxu1  ;;  %1649 = vmatprep.subr.bf16.mxu1 %v1734_v8 }
 0x55c   :  { %v841_v40 = vadd.f32 %v835_v36, %v1992_v31  ;;  %v827_v41 = vadd.f32 %v1431_v28, %v826_v38  ;;  %v842_v46 = vrot.slane %v838_v37, 7  ;;  %v854_v47 = vrot.slane %v838_v37, 1  ;;  %v1440_v28 = vld [vmem:[#allocation7 + $0x4] ss:$0 sm:$0xff]  ;;  %1650 = vmatpush3.bf16.msra.mxu1 %v1734_v8 }
 0x55e   :  { %v839_v43 = vadd.f32 %v827_v41, %v1995_v5  ;;  %872 = vrot.lane.b32.xlu1 %v841_v40, %s1839_s0  ;;  %866 = vrot.lane.b32.xlu0 %v838_v37, %s1839_s0  ;;  %v845_v24 = vrot.slane %v841_v40, 7  ;;  %v857_v52 = vrot.slane %v841_v40, 1 }
 0x560   :  { %v855_v48 = vrot.slane %v839_v43, 1  ;;  %v843_v30 = vrot.slane %v839_v43, 7  ;;  %v846_v31 = vsel %vm126_vm3, %v844_v44, %v845_v24  ;;  %v849_v50 = vsel %vm126_vm3, %v845_v24, %v842_v46  ;;  %v1735_v24 = vld [vmem:[#allocation5 + $0x140] sm:$0xff]  }
 0x561   :  { %v858_v56 = vsel %vm139_vm0, %v856_v49, %v857_v52  ;;  %v861_v57 = vsel %vm139_vm0, %v857_v52, %v854_v47  ;;  %v850_v0 = vsel %vm1931_vm4, %v849_v50, 0.0  ;;  %1651 = vmatprep.subr.bf16.mxu1 %v1735_v24 }
 0x562   :  { %868 = vrot.lane.b32.xlu1 %v839_v43, %s1839_s0  ;;  %v860_v5 = vsel %vm139_vm0, %v854_v47, %v855_v48  ;;  %v859_v51 = vsel %vm139_vm0, %v855_v48, %v856_v49  ;;  %v847_v53 = vsel %vm126_vm3, %v843_v30, %v844_v44  ;;  %v848_v54 = vsel %vm126_vm3, %v842_v46, %v843_v30 }
 0x563   :  { %878 = vrot.lane.b32.xlu0 %v860_v5, %s1831_s15  ;;  %v863_v55 = vsel %vm1896_vm1, %v859_v51, 0.0  ;;  %v865_v58 = vsel %vm1910_vm2, %v861_v57, 0.0  ;;  %v852_v11 = vsel %vm1941_vm5, %v847_v53, 0.0  ;;  %1652 = vmatpush3.bf16.msra.mxu1 %v1735_v24 }
 0x566   :  { %880 = vrot.lane.b32.xlu1 %v863_v55, %s1831_s15 }
 0x567   :  { %882 = vrot.lane.b32.xlu0 %v858_v56, %s1831_s15 }
 0x56a   :  { %884 = vrot.lane.b32.xlu1 %v865_v58, %s1831_s15 }
 0x5cc   :  { %v871_v59 = vpop.permute.xlu0 %870 }
 0x5cd   :  { %v876_v13 = vadd.f32 %v871_v59, %v852_v11 }
 0x5d0   :  { %v873_v60 = vpop.permute.xlu1 %872  ;;  %v867_v61 = vpop.permute.xlu0 %866 }
 0x5d1   :  { %v874_v2 = vadd.f32 %v867_v61, %v850_v0  ;;  %v877_v14 = vadd.f32 %v873_v60, %v846_v31 }
 0x5d4   :  { %v869_v62 = vpop.permute.xlu1 %868 }
 0x5d5   :  { %v879_v63 = vpop.permute.xlu0 %878  ;;  %v875_v3 = vadd.f32 %v869_v62, %v848_v54 }
 0x5d6   :  { %v886_v9 = vadd.f32 %v879_v63, %v874_v2 }
 0x5d8   :  { %v881_v4 = vpop.permute.xlu1 %880 }
 0x5d9   :  { %v887_v10 = vadd.f32 %v881_v4, %v875_v3  ;;  %v883_v12 = vpop.permute.xlu0 %882 }
 0x5da   :  { %v888_v18 = vadd.f32 %v883_v12, %v876_v13 }
 0x5db   :  { %v890_v16 = vpack.c.bf16 %v887_v10, %v886_v9 }
 0x5dc   :  { %v885_v17 = vpop.permute.xlu1 %884 }
 0x5dd   :  { %v889_v19 = vadd.f32 %v885_v17, %v877_v14  ;;  %1633 = vmatprep.mubr.bf16.mxu0 %v890_v16 }
 0x5df   :  { %v891_v21 = vpack.c.bf16 %v889_v19, %v888_v18 }
 0x5e1   :  { %1634 = vmatmul.mubr.bf16.vlgmr.msra.gmra.mxu0 %v891_v21 }
 0x5e2   :  { %1658 = vmatpush3.bf16.msra.mxu0 %v1736_v27 }
 0x6a1   :  { %v1635_v29 = vpop.f32.mrf.mxu0 }
 0x6a2   :  { %v1008_v33 = vadd.f32 %v1635_v29, %v1440_v28  ;;  %v1738_v29 = vld [vmem:[#allocation5 + $0x1a8] sm:$0xff]  }
 0x6a3   :  { %v999_v34 = vpop.f32.mrf.mxu0 }
 0x6a4   :  { %v1020_v6 = vmul.f32 0.2, %v1008_v33  ;;  %v1000_v35 = vadd.f32 %v1440_v28, %v999_v34  ;;  %vm1016_vm14 = vcmp.gt.f32.partialorder %v1008_v33, 0.0  ;;  %v1449_v34 = vld [vmem:[#allocation7 + $0x5] ss:$0 sm:$0xff] }
 0x6a5   :  { %v1636_v7 = vpop.f32.mrf.mxu0 }
 0x6a6   :  { %v1018_v36 = vmul.f32 0.2, %v1000_v35  ;;  %v1011_v37 = vadd.f32 %v1636_v7, %v1440_v28  ;;  %v1024_v38 = vsel %vm1016_vm14, %v1008_v33, %v1020_v6  ;;  %vm1014_vm15 = vcmp.gt.f32.partialorder %v1000_v35, 0.0  ;;  %v1740_v33 = vld [vmem:[#allocation5 + $0x198] sm:$0xff]  }
 0x6a7   :  { %1054 = vrot.lane.b32.xlu0 %v1024_v38, %s1839_s0  ;;  %v1002_v40 = vpop.f32.mrf.mxu0  ;;  %v1028_v48 = vrot.slane %v1024_v38, 7  ;;  %v1040_v31 = vrot.slane %v1024_v38, 1 }
 0x6a8   :  { %v1021_v41 = vmul.f32 0.2, %v1011_v37  ;;  %v1003_v42 = vadd.f32 %v1440_v28, %v1002_v40  ;;  %vm1017_vm6 = vcmp.gt.f32.partialorder %v1011_v37, 0.0  ;;  %v1022_v43 = vsel %vm1014_vm15, %v1000_v35, %v1018_v36  ;;  %v1737_v28 = vld [vmem:[#allocation5 + $0x1b0] sm:$0xff]   ;;  %v1742_v40 = vld [vmem:[#allocation5 + $0x188] sm:$0xff]  }
 0x6a9   :  { %v1026_v49 = vrot.slane %v1022_v43, 7  ;;  %v1038_v50 = vrot.slane %v1022_v43, 1  ;;  %1659 = vmatprep.subr.bf16.mxu0 %v1737_v28  ;;  %v1741_v35 = vld [vmem:[#allocation5 + $0x190] sm:$0xff]  }
 0x6aa   :  { %v1019_v44 = vmul.f32 0.2, %v1003_v42  ;;  %v1025_v46 = vsel %vm1017_vm6, %v1011_v37, %v1021_v41  ;;  %vm1015_vm7 = vcmp.gt.f32.partialorder %v1003_v42, 0.0  ;;  %1660 = vmatpush3.bf16.msra.mxu0 %v1737_v28 }
 0x6ab   :  { %1056 = vrot.lane.b32.xlu1 %v1025_v46, %s1839_s0  ;;  %v1029_v47 = vrot.slane %v1025_v46, 7  ;;  %1050 = vrot.lane.b32.xlu0 %v1022_v43, %s1839_s0  ;;  %v1041_v54 = vrot.slane %v1025_v46, 1 }
 0x6ac   :  { %v1023_v30 = vsel %vm1015_vm7, %v1003_v42, %v1019_v44  ;;  %1661 = vmatprep.subr.bf16.mxu0 %v1738_v29 }
 0x6ad   :  { %v1027_v5 = vrot.slane %v1023_v30, 7  ;;  %v1039_v51 = vrot.slane %v1023_v30, 1  ;;  %v1030_v52 = vsel %vm126_vm3, %v1028_v48, %v1029_v47  ;;  %v1033_v53 = vsel %vm126_vm3, %v1029_v47, %v1026_v49 }
 0x6ae   :  { %v1042_v60 = vsel %vm139_vm0, %v1040_v31, %v1041_v54  ;;  %v1045_v61 = vsel %vm139_vm0, %v1041_v54, %v1038_v50  ;;  %v1034_v9 = vsel %vm1931_vm4, %v1033_v53, 0.0  ;;  %1662 = vmatpush3.bf16.msra.mxu0 %v1738_v29 }
 0x6af   :  { %1052 = vrot.lane.b32.xlu1 %v1023_v30, %s1839_s0  ;;  %v1044_v55 = vsel %vm139_vm0, %v1038_v50, %v1039_v51  ;;  %v1043_v56 = vsel %vm139_vm0, %v1039_v51, %v1040_v31  ;;  %v1031_v57 = vsel %vm126_vm3, %v1027_v5, %v1028_v48  ;;  %v1032_v58 = vsel %vm126_vm3, %v1026_v49, %v1027_v5  ;;  %v1743_v48 = vld [vmem:[#allocation5 + $0x180] sm:$0xff]  }
 0x6b0   :  { %1062 = vrot.lane.b32.xlu0 %v1044_v55, %s1831_s15  ;;  %v1047_v59 = vsel %vm1896_vm1, %v1043_v56, 0.0  ;;  %v1049_v62 = vsel %vm1910_vm2, %v1045_v61, 0.0  ;;  %v1036_v16 = vsel %vm1941_vm5, %v1031_v57, 0.0  ;;  %1663 = vmatprep.subr.bf16.mxu0 %v1739_v32 }
 0x6b2   :  { %1664 = vmatpush3.bf16.msra.mxu0 %v1739_v32 }
 0x6b3   :  { %1064 = vrot.lane.b32.xlu1 %v1047_v59, %s1831_s15  ;;  %1665 = vmatprep.subr.bf16.mxu0 %v1740_v33 }
 0x6b4   :  { %1066 = vrot.lane.b32.xlu0 %v1042_v60, %s1831_s15 }
 0x6b6   :  { %1666 = vmatpush3.bf16.msra.mxu0 %v1740_v33 }
 0x6b7   :  { %1068 = vrot.lane.b32.xlu1 %v1049_v62, %s1831_s15  ;;  %1667 = vmatprep.subr.bf16.mxu0 %v1741_v35 }
 0x6ba   :  { %1668 = vmatpush3.bf16.msra.mxu0 %v1741_v35 }
 0x6bb   :  { %1669 = vmatprep.subr.bf16.mxu0 %v1742_v40 }
 0x6be   :  { %1670 = vmatpush3.bf16.msra.mxu0 %v1742_v40 }
 0x6bf   :  { %1671 = vmatprep.subr.bf16.mxu0 %v1743_v48 }
 0x6c2   :  { %1672 = vmatpush3.bf16.msra.mxu0 %v1743_v48 }
 0x719   :  { %v1055_v63 = vpop.permute.xlu0 %1054 }
 0x71a   :  { %v1060_v18 = vadd.f32 %v1055_v63, %v1036_v16 }
 0x71d   :  { %v1057_v0 = vpop.permute.xlu1 %1056  ;;  %v1051_v2 = vpop.permute.xlu0 %1050 }
 0x71e   :  { %v1058_v10 = vadd.f32 %v1051_v2, %v1034_v9  ;;  %v1061_v19 = vadd.f32 %v1057_v0, %v1030_v52 }
 0x721   :  { %v1053_v3 = vpop.permute.xlu1 %1052 }
 0x722   :  { %v1063_v4 = vpop.permute.xlu0 %1062  ;;  %v1059_v11 = vadd.f32 %v1053_v3, %v1032_v58 }
 0x723   :  { %v1070_v13 = vadd.f32 %v1063_v4, %v1058_v10 }
 0x725   :  { %v1065_v12 = vpop.permute.xlu1 %1064 }
 0x726   :  { %v1071_v14 = vadd.f32 %v1065_v12, %v1059_v11  ;;  %v1067_v17 = vpop.permute.xlu0 %1066 }
 0x727   :  { %v1072_v23 = vadd.f32 %v1067_v17, %v1060_v18 }
 0x728   :  { %v1074_v21 = vpack.c.bf16 %v1071_v14, %v1070_v13 }
 0x729   :  { %v1069_v22 = vpop.permute.xlu1 %1068 }
 0x72a   :  { %v1073_v25 = vadd.f32 %v1069_v22, %v1061_v19  ;;  %1653 = vmatprep.mubr.bf16.mxu1 %v1074_v21 }
 0x72c   :  { %v1075_v26 = vpack.c.bf16 %v1073_v25, %v1072_v23 }
 0x72e   :  { %1654 = vmatmul.mubr.bf16.vlgmr.msra.gmra.mxu1 %v1075_v26 }
 0x7ee   :  { %v1655_v6 = vpop.f32.mrf.mxu1 }
 0x7ef   :  { %v1192_v7 = vadd.f32 %v1655_v6, %v1449_v34 }
 0x7f0   :  { %v1183_v8 = vpop.f32.mrf.mxu1 }
 0x7f1   :  { %v1204_v36 = vmul.f32 0.2, %v1192_v7  ;;  %v1184_v37 = vadd.f32 %v1449_v34, %v1183_v8  ;;  %vm1200_vm8 = vcmp.gt.f32.partialorder %v1192_v7, 0.0 }
 0x7f2   :  { %v1656_v38 = vpop.f32.mrf.mxu1 }
 0x7f3   :  { %v1202_v41 = vmul.f32 0.2, %v1184_v37  ;;  %v1195_v42 = vadd.f32 %v1656_v38, %v1449_v34  ;;  %v1208_v43 = vsel %vm1200_vm8, %v1192_v7, %v1204_v36  ;;  %vm1198_vm9 = vcmp.gt.f32.partialorder %v1184_v37, 0.0 }
 0x7f4   :  { %1238 = vrot.lane.b32.xlu0 %v1208_v43, %s1839_s0  ;;  %v1186_v24 = vpop.f32.mrf.mxu1  ;;  %v1212_v50 = vrot.slane %v1208_v43, 7  ;;  %v1224_v52 = vrot.slane %v1208_v43, 1 }
 0x7f5   :  { %v1205_v44 = vmul.f32 0.2, %v1195_v42  ;;  %v1187_v46 = vadd.f32 %v1449_v34, %v1186_v24  ;;  %vm1201_vm10 = vcmp.gt.f32.partialorder %v1195_v42, 0.0  ;;  %v1206_v47 = vsel %vm1198_vm9, %v1184_v37, %v1202_v41 }
 0x7f6   :  { %v1210_v5 = vrot.slane %v1206_v47, 7  ;;  %v1222_v53 = vrot.slane %v1206_v47, 1 }
 0x7f7   :  { %v1203_v49 = vmul.f32 0.2, %v1187_v46  ;;  %v1209_v30 = vsel %vm1201_vm10, %v1195_v42, %v1205_v44  ;;  %vm1199_vm11 = vcmp.gt.f32.partialorder %v1187_v46, 0.0 }
 0x7f8   :  { %1240 = vrot.lane.b32.xlu1 %v1209_v30, %s1839_s0  ;;  %v1213_v31 = vrot.slane %v1209_v30, 7  ;;  %1234 = vrot.lane.b32.xlu0 %v1206_v47, %s1839_s0  ;;  %v1225_v58 = vrot.slane %v1209_v30, 1 }
 0x7f9   :  { %v1207_v51 = vsel %vm1199_vm11, %v1187_v46, %v1203_v49 }
 0x7fa   :  { %v1211_v54 = vrot.slane %v1207_v51, 7  ;;  %v1223_v55 = vrot.slane %v1207_v51, 1  ;;  %v1214_v56 = vsel %vm126_vm3, %v1212_v50, %v1213_v31  ;;  %v1217_v57 = vsel %vm126_vm3, %v1213_v31, %v1210_v5 }
 0x7fb   :  { %v1226_v0 = vsel %vm139_vm0, %v1224_v52, %v1225_v58  ;;  %v1229_v2 = vsel %vm139_vm0, %v1225_v58, %v1222_v53  ;;  %v1218_v12 = vsel %vm1931_vm4, %v1217_v57, 0.0 }
 0x7fc   :  { %1236 = vrot.lane.b32.xlu1 %v1207_v51, %s1839_s0  ;;  %v1228_v59 = vsel %vm139_vm0, %v1222_v53, %v1223_v55  ;;  %v1227_v60 = vsel %vm139_vm0, %v1223_v55, %v1224_v52  ;;  %v1215_v61 = vsel %vm126_vm3, %v1211_v54, %v1212_v50  ;;  %v1216_v62 = vsel %vm126_vm3, %v1210_v5, %v1211_v54 }
 0x7fd   :  { %1246 = vrot.lane.b32.xlu0 %v1228_v59, %s1831_s15  ;;  %v1231_v63 = vsel %vm1896_vm1, %v1227_v60, 0.0  ;;  %v1233_v3 = vsel %vm1910_vm2, %v1229_v2, 0.0  ;;  %v1220_v18 = vsel %vm1941_vm5, %v1215_v61, 0.0 }
 0x800   :  { %1248 = vrot.lane.b32.xlu1 %v1231_v63, %s1831_s15 }
 0x801   :  { %1250 = vrot.lane.b32.xlu0 %v1226_v0, %s1831_s15 }
 0x804   :  { %1252 = vrot.lane.b32.xlu1 %v1233_v3, %s1831_s15 }
 0x866   :  { %v1239_v4 = vpop.permute.xlu0 %1238 }
 0x867   :  { %v1244_v19 = vadd.f32 %v1239_v4, %v1220_v18 }
 0x86a   :  { %v1241_v9 = vpop.permute.xlu1 %1240  ;;  %v1235_v10 = vpop.permute.xlu0 %1234 }
 0x86b   :  { %v1242_v13 = vadd.f32 %v1235_v10, %v1218_v12  ;;  %v1245_v21 = vadd.f32 %v1241_v9, %v1214_v56 }
 0x86e   :  { %v1237_v15 = vpop.permute.xlu1 %1236 }
 0x86f   :  { %v1247_v11 = vpop.permute.xlu0 %1246  ;;  %v1243_v14 = vadd.f32 %v1237_v15, %v1216_v62 }
 0x870   :  { %v1254_v1 = vadd.f32 %v1247_v11, %v1242_v13 }
 0x872   :  { %v1249_v16 = vpop.permute.xlu1 %1248 }
 0x873   :  { %v1255_v17 = vadd.f32 %v1249_v16, %v1243_v14  ;;  %v1251_v20 = vpop.permute.xlu0 %1250 }
 0x874   :  { %v1256_v25 = vadd.f32 %v1251_v20, %v1244_v19 }
 0x875   :  { %v1258_v22 = vpack.c.bf16 %v1255_v17, %v1254_v1 }
 0x876   :  { %v1253_v23 = vpop.permute.xlu1 %1252 }
 0x877   :  { %v1257_v26 = vadd.f32 %v1253_v23, %v1245_v21  ;;  %1673 = vmatprep.mubr.bf16.mxu0 %v1258_v22 }
 0x879   :  { %v1259_v27 = vpack.c.bf16 %v1257_v26, %v1256_v25 }
 0x87b   :  { %1674 = vmatmul.mubr.bf16.vlgmr.msra.gmra.mxu0 %v1259_v27 }
 0x93b   :  { %v1675_v28 = vpop.f32.mrf.mxu0 }
 0x93c   :  { %v1376_v29 = vadd.f32 %v1675_v28, %v1458_v39 }
 0x93d   :  { %v1367_v32 = vpop.f32.mrf.mxu0 }
 0x93e   :  { %1384 = vst [vmem:[#allocation8 + $0x10] sm:$0xff] %v1376_v29  ;;  %v1368_v33 = vadd.f32 %v1458_v39, %v1367_v32 }
 0x93f   :  { %v1676_v34 = vpop.f32.mrf.mxu0 }
 0x940   :  { %1382 = vst [vmem:[#allocation8] sm:$0xff] %v1368_v33  ;;  %v1379_v45 = vadd.f32 %v1676_v34, %v1458_v39 }
 0x941   :  { %v1370_v6 = vpop.f32.mrf.mxu0 }
 0x942   :  { %1385 = vst [vmem:[#allocation8 + $0x18] sm:$0xff] %v1379_v45  ;;  %v1371_v35 = vadd.f32 %v1458_v39, %v1370_v6 }
 0x944   :  { %1383 = vst [vmem:[#allocation8 + $0x8] sm:$0xff] %v1371_v35 }
 0x945   :  { %1815 = shalt.err (!%p1812_p5)
}
 0x946   :  { %1397 = dma.vmem_to_hbm [thread:$0]  %s1392_s6, 512, %s2180_s3, [#allocation4], %s1834_s22, %s1834_s22, %s1835_s23  }
 0x947   :  { %1828 = dma.done.wait [#allocation4], 512  }
 0x948   :  { %1829 = vsyncadd [#allocation4], 4294966784 }
 0x949   :  { %1401 = vsyncpa [#allocation3], 1 }
 0x94a   :  { %1402 = vsyncpa [#allocation6], 1 }
 0x94b   :  { %1403 = vsyncpa [#allocation4], 1 }

</bundles_post_ra>
